<compile_context>
chip_gen: v5e
topology: v5e:2x2
jax: 0.10.0
libtpu: 0.0.40
codegen_flags: <defaults>
</compile_context>

<pallas_src>
import functools

import jax
import jax.numpy as jnp
from jax.experimental import pallas as pl
from jax.experimental.pallas import tpu as pltpu

EPS = 1e-5
NEG_INF = -1e30


def _layer_norm(v, gamma, beta):
    mu = jnp.mean(v, axis=-1, keepdims=True)
    var = jnp.mean((v - mu) ** 2, axis=-1, keepdims=True)  # unbiased=False, as in the module
    return (v - mu) * jax.lax.rsqrt(var + EPS) * gamma + beta


def _gelu_tanh(x):
    # GELU with tanh approximation (the hand-rolled GELU used in this GPT implementation).
    return 0.5 * x * (1.0 + jnp.tanh(jnp.sqrt(2.0 / jnp.pi) * (x + 0.044715 * x * x * x)))


def transformer_block_kernel(
    x_ref, ln1g_ref, ln1b_ref,
    wqkv_ref, wo_ref, bo_ref,
    ln2g_ref, ln2b_ref,
    w1_ref, b1_ref, w2_ref, b2_ref,
    out_ref,
    *, num_heads, head_dim,
):
    bf16 = jnp.bfloat16
    f32 = jnp.float32
    x = x_ref[...]                                   # (T, D) f32, one batch element
    T, D = x.shape
    H, hd = num_heads, head_dim

    # ---- LayerNorm 1 (f32 statistics) ----
    h1 = _layer_norm(x, ln1g_ref[...], ln1b_ref[...])
    hb = h1.astype(bf16)                             # bf16 operand for the MXU

    # ---- fused QKV: one lane-dense (T, D) @ (D, 3D) matmul ----
    qkv = jnp.dot(hb, wqkv_ref[...], preferred_element_type=f32)       # (T, 3D)

    inv_sqrt_hd = 1.0 / (head_dim ** 0.5)
    # Fold the softmax scale into q (O(T*hd) work), then split heads: (T, D) -> (H, T, hd).
    q = (qkv[:, 0:D] * inv_sqrt_hd).reshape(T, H, hd).transpose(1, 0, 2).astype(bf16)
    k = qkv[:, D:2 * D].reshape(T, H, hd).transpose(1, 0, 2).astype(bf16)
    v = qkv[:, 2 * D:3 * D].reshape(T, H, hd).transpose(1, 0, 2).astype(bf16)

    # ---- (T, T) causal bias, shared across heads; no cross-batch rows exist ----
    row = jax.lax.broadcasted_iota(jnp.int32, (T, T), 0)
    col = jax.lax.broadcasted_iota(jnp.int32, (T, T), 1)
    bias = jnp.where(row >= col, 0.0, NEG_INF).astype(f32)

    # ---- head-batched attention ----
    s = jnp.einsum("hqd,hkd->hqk", q, k, preferred_element_type=f32) + bias[None]   # (H,T,T)
    m = jnp.max(s, axis=-1, keepdims=True)
    p = jnp.exp(s - m)
    denom = jnp.sum(p, axis=-1, keepdims=True)
    # Every row keeps its diagonal entry -> denom > 0, so the approx reciprocal is safe.
    p = p * pl.reciprocal(denom, approx=True)        # divide on EUP; VALU stays free
    # attention dropout: identity (drop_rate = 0)

    ctx = jnp.einsum("hqk,hkd->hqd", p.astype(bf16), v, preferred_element_type=f32)  # (H,T,hd)
    ctx = ctx.transpose(1, 0, 2).reshape(T, D)       # concat heads -> lane-dense (T, D)

    # ---- single output projection over the concatenated context ----
    attn = jnp.dot(ctx.astype(bf16), wo_ref[...], preferred_element_type=f32) + bo_ref[...]
    # dropout: identity; residual 1
    x = x + attn

    # ---- LayerNorm 2 + FeedForward (D -> 4D -> D, tanh-GELU in f32) ----
    h2 = _layer_norm(x, ln2g_ref[...], ln2b_ref[...])
    ff = jnp.dot(h2.astype(bf16), w1_ref[...], preferred_element_type=f32) + b1_ref[...]
    ff = _gelu_tanh(ff)
    ff = jnp.dot(ff.astype(bf16), w2_ref[...], preferred_element_type=f32) + b2_ref[...]

    # dropout: identity; residual 2
    out_ref[...] = x + ff


def prepare_block_params(params):
    """One-time (load-time) weight layout + bf16 cast, hoisted out of the per-call path."""
    (ln1g, ln1b, wq, wk, wv, wo, bo, ln2g, ln2b, w1, b1, w2, b2) = params
    bf16 = jnp.bfloat16
    wqkv = jnp.concatenate([wq, wk, wv], axis=1).astype(bf16)          # (D, 3D) fused QKV
    return (ln1g, ln1b, wqkv, wo.astype(bf16), bo,
            ln2g, ln2b, w1.astype(bf16), b1, w2.astype(bf16), b2)


def transformer_block(x, prepared, *, num_heads):
    B, T, D = x.shape
    hd = D // num_heads
    (ln1g, ln1b, wqkv, wo, bo, ln2g, ln2b, w1, b1, w2, b2) = prepared
    args = (x, ln1g, ln1b, wqkv, wo, bo, ln2g, ln2b, w1, b1, w2, b2)

    def const_spec(a):
        # Weights use constant block indices -> fetched once, resident across grid steps.
        zeros = (0,) * a.ndim
        return pl.BlockSpec(a.shape, lambda b, _z=zeros: _z)

    in_specs = [pl.BlockSpec((None, T, D), lambda b: (b, 0, 0))]       # one batch row-block
    in_specs += [const_spec(a) for a in args[1:]]
    out_specs = pl.BlockSpec((None, T, D), lambda b: (b, 0, 0))

    kernel = functools.partial(transformer_block_kernel, num_heads=num_heads, head_dim=hd)

    return pl.pallas_call(
        kernel,
        out_shape=jax.ShapeDtypeStruct((B, T, D), jnp.float32),
        grid=(B,),                                                     # batch is a real grid axis
        in_specs=in_specs,
        out_specs=out_specs,
        compiler_params=pltpu.CompilerParams(dimension_semantics=("parallel",)),
    )(*args)


# ---------------- references ----------------

def transformer_block_ref_f32(x, params, *, num_heads):
    """True f32 reference mirroring the PyTorch module (exact softmax, no bf16 casts)."""
    (ln1g, ln1b, wq, wk, wv, wo, bo, ln2g, ln2b, w1, b1, w2, b2) = params
    B, T, D = x.shape
    hd = D // num_heads
    h = _layer_norm(x, ln1g, ln1b)
    q = (h @ wq).reshape(B, T, num_heads, hd).transpose(0, 2, 1, 3)
    k = (h @ wk).reshape(B, T, num_heads, hd).transpose(0, 2, 1, 3)
    v = (h @ wv).reshape(B, T, num_heads, hd).transpose(0, 2, 1, 3)
    s = jnp.einsum("bhqd,bhkd->bhqk", q, k) / (hd ** 0.5)
    causal = jnp.tril(jnp.ones((T, T), dtype=bool))
    s = jnp.where(causal[None, None], s, -jnp.inf)
    p = jax.nn.softmax(s, axis=-1)
    ctx = jnp.einsum("bhqk,bhkd->bhqd", p, v).transpose(0, 2, 1, 3).reshape(B, T, D)
    attn = ctx @ wo + bo
    x = x + attn
    h2 = _layer_norm(x, ln2g, ln2b)
    ff = _gelu_tanh(h2 @ w1 + b1) @ w2 + b2
    return x + ff


def transformer_block_ref_mixed(x, params, *, num_heads):
    """Pure-JAX reference mirroring the kernel's mixed precision (bf16 operands, f32 accum)."""
    (ln1g, ln1b, wq, wk, wv, wo, bo, ln2g, ln2b, w1, b1, w2, b2) = params
    B, T, D = x.shape
    hd = D // num_heads
    bf16, f32 = jnp.bfloat16, jnp.float32
    scale = 1.0 / (hd ** 0.5)

    h = _layer_norm(x, ln1g, ln1b).astype(bf16)
    q = jnp.einsum("btd,de->bte", h, wq.astype(bf16), preferred_element_type=f32) * scale
    k = jnp.einsum("btd,de->bte", h, wk.astype(bf16), preferred_element_type=f32)
    v = jnp.einsum("btd,de->bte", h, wv.astype(bf16), preferred_element_type=f32)
    q = q.reshape(B, T, num_heads, hd).transpose(0, 2, 1, 3).astype(bf16)
    k = k.reshape(B, T, num_heads, hd).transpose(0, 2, 1, 3).astype(bf16)
    v = v.reshape(B, T, num_heads, hd).transpose(0, 2, 1, 3).astype(bf16)
    s = jnp.einsum("bhqd,bhkd->bhqk", q, k, preferred_element_type=f32)
    causal = jnp.tril(jnp.ones((T, T), dtype=bool))
    s = s + jnp.where(causal, 0.0, NEG_INF)[None, None]
    m = jnp.max(s, axis=-1, keepdims=True)
    p = jnp.exp(s - m)
    p = p / jnp.sum(p, axis=-1, keepdims=True)
    ctx = jnp.einsum("bhqk,bhkd->bhqd", p.astype(bf16), v, preferred_element_type=f32)
    ctx = ctx.transpose(0, 2, 1, 3).reshape(B, T, D)
    attn = jnp.einsum("btd,de->bte", ctx.astype(bf16), wo.astype(bf16),
                      preferred_element_type=f32) + bo
    x = x + attn
    h2 = _layer_norm(x, ln2g, ln2b)
    ff = jnp.einsum("btd,dh->bth", h2.astype(bf16), w1.astype(bf16),
                    preferred_element_type=f32) + b1
    ff = _gelu_tanh(ff)
    ff = jnp.einsum("bth,hd->btd", ff.astype(bf16), w2.astype(bf16),
                    preferred_element_type=f32) + b2
    return x + ff


if __name__ == "__main__":
    # config: emb_dim=128 (lane-dense), context_length=16, n_heads=4, drop_rate=0.0, qkv_bias=False
    B, T, D, H = 2, 16, 128, 4
    HID = 4 * D

    key = jax.random.PRNGKey(0)
    ks = jax.random.split(key, 8)

    x = jax.random.normal(ks[0], (B, T, D), dtype=jnp.float32)

    wscale = 0.05
    ln1g = jnp.ones((1, D), jnp.float32)
    ln1b = jnp.zeros((1, D), jnp.float32)
    wq = wscale * jax.random.normal(ks[1], (D, D), jnp.float32)
    wk = wscale * jax.random.normal(ks[2], (D, D), jnp.float32)
    wv = wscale * jax.random.normal(ks[3], (D, D), jnp.float32)
    wo = wscale * jax.random.normal(ks[4], (D, D), jnp.float32)
    bo = jnp.zeros((1, D), jnp.float32)
    ln2g = jnp.ones((1, D), jnp.float32)
    ln2b = jnp.zeros((1, D), jnp.float32)
    w1 = wscale * jax.random.normal(ks[5], (D, HID), jnp.float32)
    b1 = 0.01 * jax.random.normal(ks[6], (1, HID), jnp.float32)
    w2 = wscale * jax.random.normal(ks[7], (HID, D), jnp.float32)
    b2 = jnp.zeros((1, D), jnp.float32)

    params = (ln1g, ln1b, wq, wk, wv, wo, bo, ln2g, ln2b, w1, b1, w2, b2)

    prepared = prepare_block_params(params)          # one-time layout/cast (load time)
    out = transformer_block(x, prepared, num_heads=H)
    out = jax.block_until_ready(out)
    assert out.shape == (B, T, D)

    ref_mix = transformer_block_ref_mixed(x, params, num_heads=H)
    ref_f32 = transformer_block_ref_f32(x, params, num_heads=H)
    err_mix = float(jnp.max(jnp.abs(out - ref_mix)))
    err_f32 = float(jnp.max(jnp.abs(out - ref_f32)))
    assert jnp.allclose(out, ref_mix, rtol=1e-2, atol=1e-2), \
        f"mismatch vs bf16-mirrored reference (max abs err {err_mix})"
    assert jnp.allclose(out, ref_f32, rtol=3e-2, atol=3e-2), \
        f"mismatch vs true-f32 reference (max abs err {err_f32})"

    print("KERNEL_OK")
</pallas_src>

<mosaic_0001>
module attributes {stable_mosaic.version = 11 : i64} {
  func.func @transformer_block_kernel(%arg0: i32, %arg1: memref<1x16x128xf32, #tpu.memory_space<vmem>>, %arg2: memref<1x128xf32, #tpu.memory_space<vmem>>, %arg3: memref<1x128xf32, #tpu.memory_space<vmem>>, %arg4: memref<128x384xbf16, #tpu.memory_space<vmem>>, %arg5: memref<128x128xbf16, #tpu.memory_space<vmem>>, %arg6: memref<1x128xf32, #tpu.memory_space<vmem>>, %arg7: memref<1x128xf32, #tpu.memory_space<vmem>>, %arg8: memref<1x128xf32, #tpu.memory_space<vmem>>, %arg9: memref<128x512xbf16, #tpu.memory_space<vmem>>, %arg10: memref<1x512xf32, #tpu.memory_space<vmem>>, %arg11: memref<512x128xbf16, #tpu.memory_space<vmem>>, %arg12: memref<1x128xf32, #tpu.memory_space<vmem>>, %arg13: memref<1x16x128xf32, #tpu.memory_space<vmem>>) attributes {dimension_semantics = [#tpu.dimension_semantics<parallel>], iteration_bounds = array<i64: 2>, scalar_prefetch = 0 : i64, scratch_operands = 0 : i64, tpu.core_type = #tpu.core_type<tc>, window_params = [{transform_indices = @transform_0, window_bounds = array<i64: 1, 16, 128>}, {pipeline_mode = #tpu.pipeline_mode<synchronous>, transform_indices = @transform_1, window_bounds = array<i64: 1, 128>}, {pipeline_mode = #tpu.pipeline_mode<synchronous>, transform_indices = @transform_2, window_bounds = array<i64: 1, 128>}, {pipeline_mode = #tpu.pipeline_mode<synchronous>, transform_indices = @transform_3, window_bounds = array<i64: 128, 384>}, {pipeline_mode = #tpu.pipeline_mode<synchronous>, transform_indices = @transform_4, window_bounds = array<i64: 128, 128>}, {pipeline_mode = #tpu.pipeline_mode<synchronous>, transform_indices = @transform_5, window_bounds = array<i64: 1, 128>}, {pipeline_mode = #tpu.pipeline_mode<synchronous>, transform_indices = @transform_6, window_bounds = array<i64: 1, 128>}, {pipeline_mode = #tpu.pipeline_mode<synchronous>, transform_indices = @transform_7, window_bounds = array<i64: 1, 128>}, {pipeline_mode = #tpu.pipeline_mode<synchronous>, transform_indices = @transform_8, window_bounds = array<i64: 128, 512>}, {pipeline_mode = #tpu.pipeline_mode<synchronous>, transform_indices = @transform_9, window_bounds = array<i64: 1, 512>}, {pipeline_mode = #tpu.pipeline_mode<synchronous>, transform_indices = @transform_10, window_bounds = array<i64: 512, 128>}, {pipeline_mode = #tpu.pipeline_mode<synchronous>, transform_indices = @transform_11, window_bounds = array<i64: 1, 128>}, {transform_indices = @transform_12, window_bounds = array<i64: 1, 16, 128>}]} {
    %c0 = arith.constant 0 : index
    %c0_0 = arith.constant 0 : index
    %c0_1 = arith.constant 0 : index
    %0 = vector.load %arg1[%c0, %c0_0, %c0_1] : memref<1x16x128xf32, #tpu.memory_space<vmem>>, vector<1x16x128xf32>
    %1 = vector.shape_cast %0 : vector<1x16x128xf32> to vector<16x128xf32>
    %c0_2 = arith.constant 0 : index
    %c0_3 = arith.constant 0 : index
    %2 = vector.load %arg2[%c0_2, %c0_3] : memref<1x128xf32, #tpu.memory_space<vmem>>, vector<1x128xf32>
    %c0_4 = arith.constant 0 : index
    %c0_5 = arith.constant 0 : index
    %3 = vector.load %arg3[%c0_4, %c0_5] : memref<1x128xf32, #tpu.memory_space<vmem>>, vector<1x128xf32>
    %cst = arith.constant dense<0.000000e+00> : vector<16xf32>
    %4 = vector.multi_reduction <add>, %1, %cst [1] : vector<16x128xf32> to vector<16xf32>
    %5 = vector.shape_cast %4 : vector<16xf32> to vector<16x1xf32>
    %cst_6 = arith.constant 1.280000e+02 : f32
    %6 = vector.broadcast %cst_6 : f32 to vector<16x1xf32>
    %7 = arith.divf %5, %6 : vector<16x1xf32>
    %8 = vector.broadcast %7 : vector<16x1xf32> to vector<16x128xf32>
    %9 = arith.subf %1, %8 : vector<16x128xf32>
    %10 = arith.mulf %9, %9 : vector<16x128xf32>
    %cst_7 = arith.constant dense<0.000000e+00> : vector<16xf32>
    %11 = vector.multi_reduction <add>, %10, %cst_7 [1] : vector<16x128xf32> to vector<16xf32>
    %12 = vector.shape_cast %11 : vector<16xf32> to vector<16x1xf32>
    %cst_8 = arith.constant 1.280000e+02 : f32
    %13 = vector.broadcast %cst_8 : f32 to vector<16x1xf32>
    %14 = arith.divf %12, %13 : vector<16x1xf32>
    %15 = vector.broadcast %7 : vector<16x1xf32> to vector<16x128xf32>
    %16 = arith.subf %1, %15 : vector<16x128xf32>
    %cst_9 = arith.constant 9.99999974E-6 : f32
    %17 = vector.broadcast %cst_9 : f32 to vector<16x1xf32>
    %18 = arith.addf %14, %17 : vector<16x1xf32>
    %19 = math.rsqrt %18 : vector<16x1xf32>
    %20 = vector.broadcast %19 : vector<16x1xf32> to vector<16x128xf32>
    %21 = arith.mulf %16, %20 : vector<16x128xf32>
    %22 = vector.broadcast %2 : vector<1x128xf32> to vector<16x128xf32>
    %23 = arith.mulf %21, %22 : vector<16x128xf32>
    %24 = vector.broadcast %3 : vector<1x128xf32> to vector<16x128xf32>
    %25 = arith.addf %23, %24 : vector<16x128xf32>
    %26 = arith.truncf %25 : vector<16x128xf32> to vector<16x128xbf16>
    %c0_10 = arith.constant 0 : index
    %c0_11 = arith.constant 0 : index
    %27 = vector.load %arg4[%c0_10, %c0_11] : memref<128x384xbf16, #tpu.memory_space<vmem>>, vector<128x384xbf16>
    %cst_12 = arith.constant dense<0.000000e+00> : vector<16x384xf32>
    %28 = tpu.matmul %26, %27, %cst_12 {dimension_numbers = #tpu.dot_dimension_numbers<[1], [0], [0], [1], [0, 0, 1, 1], [], []>} : vector<16x128xbf16>, vector<128x384xbf16>, vector<16x384xf32> -> vector<16x384xf32>
    %29 = vector.extract_strided_slice %28 {offsets = [0, 0], sizes = [16, 128], strides = [1, 1]} : vector<16x384xf32> to vector<16x128xf32>
    %cst_13 = arith.constant 0.176776692 : f32
    %30 = vector.broadcast %cst_13 : f32 to vector<16x128xf32>
    %31 = arith.mulf %29, %30 : vector<16x128xf32>
    %32 = vector.shape_cast %31 : vector<16x128xf32> to vector<16x4x32xf32>
    %33 = tpu.transpose %32, [1, 0, 2] : vector<16x4x32xf32> -> vector<4x16x32xf32>
    %34 = arith.truncf %33 : vector<4x16x32xf32> to vector<4x16x32xbf16>
    %35 = vector.extract_strided_slice %28 {offsets = [0, 128], sizes = [16, 128], strides = [1, 1]} : vector<16x384xf32> to vector<16x128xf32>
    %36 = vector.shape_cast %35 : vector<16x128xf32> to vector<16x4x32xf32>
    %37 = tpu.transpose %36, [1, 0, 2] : vector<16x4x32xf32> -> vector<4x16x32xf32>
    %38 = arith.truncf %37 : vector<4x16x32xf32> to vector<4x16x32xbf16>
    %39 = vector.extract_strided_slice %28 {offsets = [0, 256], sizes = [16, 128], strides = [1, 1]} : vector<16x384xf32> to vector<16x128xf32>
    %40 = vector.shape_cast %39 : vector<16x128xf32> to vector<16x4x32xf32>
    %41 = tpu.transpose %40, [1, 0, 2] : vector<16x4x32xf32> -> vector<4x16x32xf32>
    %42 = arith.truncf %41 : vector<4x16x32xf32> to vector<4x16x32xbf16>
    %43 = tpu.iota {dimensions = array<i32: 0>} : vector<16x16xi32>
    %44 = tpu.iota {dimensions = array<i32: 1>} : vector<16x16xi32>
    %45 = arith.cmpi sge, %43, %44 : vector<16x16xi32>
    %cst_14 = arith.constant 0.000000e+00 : f32
    %cst_15 = arith.constant -1.000000e+30 : f32
    %46 = vector.broadcast %cst_14 : f32 to vector<16x16xf32>
    %47 = vector.broadcast %cst_15 : f32 to vector<16x16xf32>
    %48 = arith.select %45, %46, %47 : vector<16x16xi1>, vector<16x16xf32>
    "tpu.trace_start"() <{level = 10 : i32, message = "hqd,hkd->hqk"}> : () -> ()
    %cst_16 = arith.constant dense<0.000000e+00> : vector<4x16x16xf32>
    %49 = tpu.matmul %34, %38, %cst_16 {dimension_numbers = #tpu.dot_dimension_numbers<[2], [2], [1], [1], [0, 0, 0, 1, 1, 1], [0], [0]>} : vector<4x16x32xbf16>, vector<4x16x32xbf16>, vector<4x16x16xf32> -> vector<4x16x16xf32>
    "tpu.trace_stop"() : () -> ()
    %50 = vector.shape_cast %48 : vector<16x16xf32> to vector<1x16x16xf32>
    %51 = vector.broadcast %50 : vector<1x16x16xf32> to vector<4x16x16xf32>
    %52 = arith.addf %49, %51 : vector<4x16x16xf32>
    %cst_17 = arith.constant dense<0xFF800000> : vector<4x16xf32>
    %53 = vector.multi_reduction <maximumf>, %52, %cst_17 [2] : vector<4x16x16xf32> to vector<4x16xf32>
    %54 = vector.shape_cast %53 : vector<4x16xf32> to vector<4x16x1xf32>
    %55 = vector.broadcast %54 : vector<4x16x1xf32> to vector<4x16x16xf32>
    %56 = arith.subf %52, %55 : vector<4x16x16xf32>
    %57 = math.exp %56 : vector<4x16x16xf32>
    %cst_18 = arith.constant dense<0.000000e+00> : vector<4x16xf32>
    %58 = vector.multi_reduction <add>, %57, %cst_18 [2] : vector<4x16x16xf32> to vector<4x16xf32>
    %59 = vector.shape_cast %58 : vector<4x16xf32> to vector<4x16x1xf32>
    %60 = tpu.reciprocal %59 {approx = true} : vector<4x16x1xf32> -> vector<4x16x1xf32>
    %61 = vector.broadcast %60 : vector<4x16x1xf32> to vector<4x16x16xf32>
    %62 = arith.mulf %57, %61 : vector<4x16x16xf32>
    %63 = arith.truncf %62 : vector<4x16x16xf32> to vector<4x16x16xbf16>
    "tpu.trace_start"() <{level = 10 : i32, message = "hqk,hkd->hqd"}> : () -> ()
    %cst_19 = arith.constant dense<0.000000e+00> : vector<4x16x32xf32>
    %64 = tpu.matmul %63, %42, %cst_19 {dimension_numbers = #tpu.dot_dimension_numbers<[2], [1], [1], [2], [0, 0, 0, 1, 1, 2], [0], [0]>} : vector<4x16x16xbf16>, vector<4x16x32xbf16>, vector<4x16x32xf32> -> vector<4x16x32xf32>
    "tpu.trace_stop"() : () -> ()
    %65 = tpu.transpose %64, [1, 0, 2] : vector<4x16x32xf32> -> vector<16x4x32xf32>
    %66 = vector.shape_cast %65 : vector<16x4x32xf32> to vector<16x128xf32>
    %67 = arith.truncf %66 : vector<16x128xf32> to vector<16x128xbf16>
    %c0_20 = arith.constant 0 : index
    %c0_21 = arith.constant 0 : index
    %68 = vector.load %arg5[%c0_20, %c0_21] : memref<128x128xbf16, #tpu.memory_space<vmem>>, vector<128x128xbf16>
    %cst_22 = arith.constant dense<0.000000e+00> : vector<16x128xf32>
    %69 = tpu.matmul %67, %68, %cst_22 {dimension_numbers = #tpu.dot_dimension_numbers<[1], [0], [0], [1], [0, 0, 1, 1], [], []>} : vector<16x128xbf16>, vector<128x128xbf16>, vector<16x128xf32> -> vector<16x128xf32>
    %c0_23 = arith.constant 0 : index
    %c0_24 = arith.constant 0 : index
    %70 = vector.load %arg6[%c0_23, %c0_24] : memref<1x128xf32, #tpu.memory_space<vmem>>, vector<1x128xf32>
    %71 = vector.broadcast %70 : vector<1x128xf32> to vector<16x128xf32>
    %72 = arith.addf %69, %71 : vector<16x128xf32>
    %73 = arith.addf %1, %72 : vector<16x128xf32>
    %c0_25 = arith.constant 0 : index
    %c0_26 = arith.constant 0 : index
    %74 = vector.load %arg7[%c0_25, %c0_26] : memref<1x128xf32, #tpu.memory_space<vmem>>, vector<1x128xf32>
    %c0_27 = arith.constant 0 : index
    %c0_28 = arith.constant 0 : index
    %75 = vector.load %arg8[%c0_27, %c0_28] : memref<1x128xf32, #tpu.memory_space<vmem>>, vector<1x128xf32>
    %cst_29 = arith.constant dense<0.000000e+00> : vector<16xf32>
    %76 = vector.multi_reduction <add>, %73, %cst_29 [1] : vector<16x128xf32> to vector<16xf32>
    %77 = vector.shape_cast %76 : vector<16xf32> to vector<16x1xf32>
    %cst_30 = arith.constant 1.280000e+02 : f32
    %78 = vector.broadcast %cst_30 : f32 to vector<16x1xf32>
    %79 = arith.divf %77, %78 : vector<16x1xf32>
    %80 = vector.broadcast %79 : vector<16x1xf32> to vector<16x128xf32>
    %81 = arith.subf %73, %80 : vector<16x128xf32>
    %82 = arith.mulf %81, %81 : vector<16x128xf32>
    %cst_31 = arith.constant dense<0.000000e+00> : vector<16xf32>
    %83 = vector.multi_reduction <add>, %82, %cst_31 [1] : vector<16x128xf32> to vector<16xf32>
    %84 = vector.shape_cast %83 : vector<16xf32> to vector<16x1xf32>
    %cst_32 = arith.constant 1.280000e+02 : f32
    %85 = vector.broadcast %cst_32 : f32 to vector<16x1xf32>
    %86 = arith.divf %84, %85 : vector<16x1xf32>
    %87 = vector.broadcast %79 : vector<16x1xf32> to vector<16x128xf32>
    %88 = arith.subf %73, %87 : vector<16x128xf32>
    %cst_33 = arith.constant 9.99999974E-6 : f32
    %89 = vector.broadcast %cst_33 : f32 to vector<16x1xf32>
    %90 = arith.addf %86, %89 : vector<16x1xf32>
    %91 = math.rsqrt %90 : vector<16x1xf32>
    %92 = vector.broadcast %91 : vector<16x1xf32> to vector<16x128xf32>
    %93 = arith.mulf %88, %92 : vector<16x128xf32>
    %94 = vector.broadcast %74 : vector<1x128xf32> to vector<16x128xf32>
    %95 = arith.mulf %93, %94 : vector<16x128xf32>
    %96 = vector.broadcast %75 : vector<1x128xf32> to vector<16x128xf32>
    %97 = arith.addf %95, %96 : vector<16x128xf32>
    %98 = arith.truncf %97 : vector<16x128xf32> to vector<16x128xbf16>
    %c0_34 = arith.constant 0 : index
    %c0_35 = arith.constant 0 : index
    %99 = vector.load %arg9[%c0_34, %c0_35] : memref<128x512xbf16, #tpu.memory_space<vmem>>, vector<128x512xbf16>
    %cst_36 = arith.constant dense<0.000000e+00> : vector<16x512xf32>
    %100 = tpu.matmul %98, %99, %cst_36 {dimension_numbers = #tpu.dot_dimension_numbers<[1], [0], [0], [1], [0, 0, 1, 1], [], []>} : vector<16x128xbf16>, vector<128x512xbf16>, vector<16x512xf32> -> vector<16x512xf32>
    %c0_37 = arith.constant 0 : index
    %c0_38 = arith.constant 0 : index
    %101 = vector.load %arg10[%c0_37, %c0_38] : memref<1x512xf32, #tpu.memory_space<vmem>>, vector<1x512xf32>
    %102 = vector.broadcast %101 : vector<1x512xf32> to vector<16x512xf32>
    %103 = arith.addf %100, %102 : vector<16x512xf32>
    %cst_39 = arith.constant 5.000000e-01 : f32
    %104 = vector.broadcast %cst_39 : f32 to vector<16x512xf32>
    %105 = arith.mulf %104, %103 : vector<16x512xf32>
    %cst_40 = arith.constant 0.636619746 : f32
    %106 = math.sqrt %cst_40 : f32
    %cst_41 = arith.constant 4.471500e-02 : f32
    %107 = vector.broadcast %cst_41 : f32 to vector<16x512xf32>
    %108 = arith.mulf %107, %103 : vector<16x512xf32>
    %109 = arith.mulf %108, %103 : vector<16x512xf32>
    %110 = arith.mulf %109, %103 : vector<16x512xf32>
    %111 = arith.addf %103, %110 : vector<16x512xf32>
    %112 = vector.broadcast %106 : f32 to vector<16x512xf32>
    %113 = arith.mulf %112, %111 : vector<16x512xf32>
    %114 = math.tanh %113 : vector<16x512xf32>
    %cst_42 = arith.constant 1.000000e+00 : f32
    %115 = vector.broadcast %cst_42 : f32 to vector<16x512xf32>
    %116 = arith.addf %115, %114 : vector<16x512xf32>
    %117 = arith.mulf %105, %116 : vector<16x512xf32>
    %118 = arith.truncf %117 : vector<16x512xf32> to vector<16x512xbf16>
    %c0_43 = arith.constant 0 : index
    %c0_44 = arith.constant 0 : index
    %119 = vector.load %arg11[%c0_43, %c0_44] : memref<512x128xbf16, #tpu.memory_space<vmem>>, vector<512x128xbf16>
    %cst_45 = arith.constant dense<0.000000e+00> : vector<16x128xf32>
    %120 = tpu.matmul %118, %119, %cst_45 {dimension_numbers = #tpu.dot_dimension_numbers<[1], [0], [0], [1], [0, 0, 1, 1], [], []>} : vector<16x512xbf16>, vector<512x128xbf16>, vector<16x128xf32> -> vector<16x128xf32>
    %c0_46 = arith.constant 0 : index
    %c0_47 = arith.constant 0 : index
    %121 = vector.load %arg12[%c0_46, %c0_47] : memref<1x128xf32, #tpu.memory_space<vmem>>, vector<1x128xf32>
    %122 = vector.broadcast %121 : vector<1x128xf32> to vector<16x128xf32>
    %123 = arith.addf %120, %122 : vector<16x128xf32>
    %124 = arith.addf %73, %123 : vector<16x128xf32>
    %c0_48 = arith.constant 0 : index
    %c0_49 = arith.constant 0 : index
    %c0_50 = arith.constant 0 : index
    %125 = vector.load %arg13[%c0_48, %c0_49, %c0_50] : memref<1x16x128xf32, #tpu.memory_space<vmem>>, vector<1x16x128xf32>
    %126 = vector.shape_cast %125 : vector<1x16x128xf32> to vector<16x128xf32>
    %127 = vector.shape_cast %124 : vector<16x128xf32> to vector<1x16x128xf32>
    tpu.vector_store %arg13[%c0_48, %c0_49, %c0_50], %127 {strides = array<i32>} : memref<1x16x128xf32, #tpu.memory_space<vmem>>, vector<1x16x128xf32>,
    return
  }
  func.func @transform_0(%arg0: i32) -> (i32, i32, i32) {
    %c0_i32 = arith.constant 0 : i32
    %c0_i32_0 = arith.constant 0 : i32
    %c0_i32_1 = arith.constant 0 : i32
    return %arg0, %c0_i32, %c0_i32_0 : i32, i32, i32
  }
  func.func @transform_1(%arg0: i32) -> (i32, i32) {
    %c0_i32 = arith.constant 0 : i32
    %c0_i32_0 = arith.constant 0 : i32
    %c0_i32_1 = arith.constant 0 : i32
    return %c0_i32, %c0_i32_0 : i32, i32
  }
  func.func @transform_2(%arg0: i32) -> (i32, i32) {
    %c0_i32 = arith.constant 0 : i32
    %c0_i32_0 = arith.constant 0 : i32
    %c0_i32_1 = arith.constant 0 : i32
    return %c0_i32, %c0_i32_0 : i32, i32
  }
  func.func @transform_3(%arg0: i32) -> (i32, i32) {
    %c0_i32 = arith.constant 0 : i32
    %c0_i32_0 = arith.constant 0 : i32
    %c0_i32_1 = arith.constant 0 : i32
    return %c0_i32, %c0_i32_0 : i32, i32
  }
  func.func @transform_4(%arg0: i32) -> (i32, i32) {
    %c0_i32 = arith.constant 0 : i32
    %c0_i32_0 = arith.constant 0 : i32
    %c0_i32_1 = arith.constant 0 : i32
    return %c0_i32, %c0_i32_0 : i32, i32
  }
  func.func @transform_5(%arg0: i32) -> (i32, i32) {
    %c0_i32 = arith.constant 0 : i32
    %c0_i32_0 = arith.constant 0 : i32
    %c0_i32_1 = arith.constant 0 : i32
    return %c0_i32, %c0_i32_0 : i32, i32
  }
  func.func @transform_6(%arg0: i32) -> (i32, i32) {
    %c0_i32 = arith.constant 0 : i32
    %c0_i32_0 = arith.constant 0 : i32
    %c0_i32_1 = arith.constant 0 : i32
    return %c0_i32, %c0_i32_0 : i32, i32
  }
  func.func @transform_7(%arg0: i32) -> (i32, i32) {
    %c0_i32 = arith.constant 0 : i32
    %c0_i32_0 = arith.constant 0 : i32
    %c0_i32_1 = arith.constant 0 : i32
    return %c0_i32, %c0_i32_0 : i32, i32
  }
  func.func @transform_8(%arg0: i32) -> (i32, i32) {
    %c0_i32 = arith.constant 0 : i32
    %c0_i32_0 = arith.constant 0 : i32
    %c0_i32_1 = arith.constant 0 : i32
    return %c0_i32, %c0_i32_0 : i32, i32
  }
  func.func @transform_9(%arg0: i32) -> (i32, i32) {
    %c0_i32 = arith.constant 0 : i32
    %c0_i32_0 = arith.constant 0 : i32
    %c0_i32_1 = arith.constant 0 : i32
    return %c0_i32, %c0_i32_0 : i32, i32
  }
  func.func @transform_10(%arg0: i32) -> (i32, i32) {
    %c0_i32 = arith.constant 0 : i32
    %c0_i32_0 = arith.constant 0 : i32
    %c0_i32_1 = arith.constant 0 : i32
    return %c0_i32, %c0_i32_0 : i32, i32
  }
  func.func @transform_11(%arg0: i32) -> (i32, i32) {
    %c0_i32 = arith.constant 0 : i32
    %c0_i32_0 = arith.constant 0 : i32
    %c0_i32_1 = arith.constant 0 : i32
    return %c0_i32, %c0_i32_0 : i32, i32
  }
  func.func @transform_12(%arg0: i32) -> (i32, i32, i32) {
    %c0_i32 = arith.constant 0 : i32
    %c0_i32_0 = arith.constant 0 : i32
    %c0_i32_1 = arith.constant 0 : i32
    return %arg0, %c0_i32, %c0_i32_0 : i32, i32, i32
  }
}

</mosaic_0001>

<bundles_post_ra>
// kernel: tpu_custom_call.1
= control target key start
LH: loop header
LB: loop body
LE: loop exit
PB: predicated region body
PF: predicated region fallthrough
CT: control target
= control target key end

     0   :  { %s5068_s0 = inlined_call_operand.hbm [shape: f32[2,16,128], index: 0, kind: input, shape index: {}]   ;;  %s5069_s1 = inlined_call_operand.hbm [shape: f32[1,128], index: 1, kind: input, shape index: {}]   ;;  %s5070_s2 = inlined_call_operand.vmem [shape: f32[1,128], index: 2, kind: input, shape index: {}]   ;;  %s5071_s3 = inlined_call_operand.hbm [shape: bf16[128,384], index: 3, kind: input, shape index: {}]   ;;  %s5072_s4 = inlined_call_operand.hbm [shape: bf16[128,128], index: 4, kind: input, shape index: {}]   ;;  %s5073_s5 = inlined_call_operand.vmem [shape: f32[1,128], index: 5, kind: input, shape index: {}]   ;;  %s5074_s6 = inlined_call_operand.vmem [shape: f32[1,128], index: 6, kind: input, shape index: {}]   ;;  %s5075_s7 = inlined_call_operand.hbm [shape: f32[1,128], index: 7, kind: input, shape index: {}]   ;;  %s5076_s8 = inlined_call_operand.hbm [shape: bf16[128,512], index: 8, kind: input, shape index: {}]   ;;  %s5077_s9 = inlined_call_operand.vmem [shape: f32[1,512], index: 9, kind: input, shape index: {}]   ;;  %s5078_s10 = inlined_call_operand.hbm [shape: bf16[512,128], index: 10, kind: input, shape index: {}]   ;;  %s5079_s11 = inlined_call_operand.vmem [shape: f32[1,128], index: 11, kind: input, shape index: {}]   ;;  %s5080_s12 = inlined_call_operand.hbm [shape: f32[2,16,128], index: 12, kind: output, shape index: {}]  }
   0x1   :  { %5082 = sst [smem:[#allocation20_spill]] %s5069_s1 }
   0x2   :  { %5083 = sst [smem:[#allocation21_spill]] %s5071_s3 }
   0x3   :  { %5084 = sst [smem:[#allocation22_spill]] %s5072_s4 }
   0x4   :  { %5085 = sst [smem:[#allocation23_spill]] %s5075_s7 }
   0x5   :  { %5086 = sst [smem:[#allocation24_spill]] %s5076_s8 }
   0x6   :  { %5087 = sst [smem:[#allocation25_spill]] %s5078_s10 }
   0x7   :  { %5088 = sst [smem:[#allocation26_spill]] %s5080_s12 }
   0x8   :  { %17 = vsyncpa [#allocation3], 0 }
   0x9   :  { %19 = vsyncpa [#allocation3 + $0x1], 0 }
   0xa   :  { %20 = vsyncpa [#allocation6], 0 }
   0xb   :  { %21 = vsyncpa [#allocation9], 0 }
   0xc   :  { %22 = vsyncpa [#allocation12], 0 }
   0xd   :  { %23 = vsyncpa [#allocation4], 0 }
   0xe   :  { %25 = vsyncpa [#allocation4 + $0x1], 0  ;;  %s4214_s21 = smov 0   ;;  %s4216_s22 = smov 0  }
   0xf   :  { %s4218_s23 = smov 0   ;;  %s4220_s24 = smov 0  }
  0x10 LB: > { %s5089_s1 = sld [smem:[#allocation20_spill]]  ;;  %s4238_s28 = sadd.s32 4294967295, %s4124_s24   ;;  %s4124_s24 = sphi %s4220_s24, %s5107_s24   ;;  %s4120_s23 = sphi %s4218_s23, %s5106_s23   ;;  %s4116_s22 = sphi %s4216_s22, %s5105_s22   ;;  %s4112_s21 = sphi %s4214_s21, %s5104_s21  }
  0x11   : > { %p3071_p0 = scmp.ge.s32.totalorder %s4124_s24, 1  ;;  %p52_p1 = scmp.eq.s32.totalorder %s4238_s28, 0 }
  0x12   : > { %p319_p2 = scmp.lt.s32.totalorder %s4124_s24, 3  ;;  %s4126_s30 = smov [#allocation5]  }
  0x13   : > { %s333_s13 = sshll.u32 %s4126_s30, 4  ;;  %s5091_s4 = sld [smem:[#allocation22_spill]]  ;;  %s334_s13 = int_to_ptr.vmem [resolvable:$true] %s333_s13 }
  0x14   : > { %p4243_p3 = pnand %p3071_p0, %p319_p2  ;;  %s4127_s18 = smov [#allocation8]  }
  0x15   : > { %s361_s19 = sshll.u32 %s4127_s18, 4  ;;  %s4128_s20 = smov 64   ;;  %s362_s19 = int_to_ptr.vmem [resolvable:$true] %s361_s19 }
  0x16   : > { %s331_s27 = sshll.u32 %s5089_s1, 4  ;;  %p3614_p5 = pneg %p4243_p3  ;;  %s332_s27 = int_to_ptr.hbm [resolvable:$true] %s331_s27 }
  0x17   : > { %s4129_s25 = smov 4   ;;  %s5093_s8 = sld [smem:[#allocation24_spill]] }
  0x18   : > { %p4255_p6 = pnand %p3614_p5, %p52_p1  ;;  %s4130_s15 = smov [#allocation11]  }
  0x19   : > { %s359_s16 = sshll.u32 %s5091_s4, 4  ;;  %s393_s1 = sshll.u32 %s4130_s15, 4  ;;  %s360_s16 = int_to_ptr.hbm [resolvable:$true] %s359_s16  ;;  %s394_s1 = int_to_ptr.vmem [resolvable:$true] %s393_s1 }
  0x1a   : > { %3617 = dma.hbm_to_vmem [thread:$0]  (!%p4255_p6), %s332_s27, 16, %s334_s13, [#allocation6]  }
  0x1b   : > { %3623 = dma.hbm_to_vmem [thread:$0]  (!%p4255_p6), %s360_s16, 1024, %s362_s19, [#allocation9], %s4128_s20, %s4128_s20, %s4129_s25  }
  0x1c   : > { %s5094_s3 = sld [smem:[#allocation21_spill]]  ;;  %s4131_s13 = smov 256  }
  0x1d   : > { %s391_s14 = sshll.u32 %s5093_s8, 4  ;;  %s4132_s12 = smov 16   ;;  %s392_s14 = int_to_ptr.hbm [resolvable:$true] %s391_s14 }
  0x1e   : > { %3629 = dma.hbm_to_vmem [thread:$0]  (!%p4255_p6), %s392_s14, 4096, %s394_s1, [#allocation12], %s4131_s13, %s4131_s13, %s4132_s12  }
  0x1f   : > { %s4133_s16 = smov [#allocation7]   ;;  %s4134_s26 = smov 192  }
  0x20   : > { %s347_s19 = sshll.u32 %s4133_s16, 4  ;;  %s4135_s30 = smov 12   ;;  %s348_s19 = int_to_ptr.vmem [resolvable:$true] %s347_s19 }
  0x21   : > { %s5095_s7 = sld [smem:[#allocation23_spill]]  ;;  %s4136_s1 = smov [#allocation10]  }
  0x22   : > { %s345_s27 = sshll.u32 %s5094_s3, 4  ;;  %s382_s12 = sshll.u32 %s4136_s1, 4  ;;  %s346_s27 = int_to_ptr.hbm [resolvable:$true] %s345_s27  ;;  %s383_s12 = int_to_ptr.vmem [resolvable:$true] %s382_s12 }
  0x23   : > { %3620 = dma.hbm_to_vmem [thread:$0]  (!%p4255_p6), %s346_s27, 3072, %s348_s19, [#allocation6], %s4134_s26, %s4134_s26, %s4135_s30  }
  0x24   : > { %s5096_s10 = sld [smem:[#allocation25_spill]]  ;;  %s4137_s27 = smov [#allocation13]  }
  0x25   : > { %s410_s19 = sshll.u32 %s4137_s27, 4  ;;  %s3070_s26 = sadd.s32 4294967294, %s4124_s24   ;;  %s411_s19 = int_to_ptr.vmem [resolvable:$true] %s410_s19 }
  0x26   : > { %s4291_s30 = sadd.s32 1, %s4124_s24   ;;  %s38_s4 = sadd.s32 1, %s4120_s23 }
  0x27   : > { %s380_s18 = sshll.u32 %s5095_s7, 4  ;;  %s35_s15 = ssub.s32 %s4124_s24, %s4291_s30  ;;  %s381_s18 = int_to_ptr.hbm [resolvable:$true] %s380_s18 }
  0x28   : > { %3626 = dma.hbm_to_vmem [thread:$0]  (!%p4255_p6), %s381_s18, 16, %s383_s12, [#allocation9]  }
  0x29   : > { %p36_p7 = scmp.eq.s32.totalorder %s35_s15, 0  ;;  %p45_p8 = scmp.ne.s32.totalorder %s4120_s23, %s4116_s22 }
  0x2a   : > { %s408_s16 = sshll.u32 %s5096_s10, 4  ;;  %p46_p9 = scmp.eq.s32.totalorder %s4124_s24, 0  ;;  %s409_s16 = int_to_ptr.hbm [resolvable:$true] %s408_s16 }
  0x2b   : > { %3632 = dma.hbm_to_vmem [thread:$0]  (!%p4255_p6), %s409_s16, 4096, %s411_s19, [#allocation12], %s4128_s20, %s4128_s20, %s4129_s25  }
  0x2c   : > { %p51_p10 = scmp.ne.s32.totalorder %s4116_s22, %s4112_s21  ;;  %p4304_p11 = por %p46_p9, %p45_p8 }
  0x2d   : > { %s4302_s18 = scalar_select %p36_p7, %s4120_s23, %s38_s4  }
  0x2e   : > { %p4310_p12 = por %p52_p1, %p51_p10  ;;  %p306_p13 = scmp.eq.s32.totalorder %s4238_s28, 1 }
  0x2f   : > { %p312_p0 = scmp.eq.s32.totalorder %s3070_s26, 1  ;;  %p3647_p2 = scmp.lt.s32.totalorder %s4124_s24, 2 }
  0x30   : > { %s427_s25 = sand.u32 1, %s4120_s23   ;;  %p4317_p5 = por %p306_p13, %p45_p8 }
  0x31   : > { %p4321_p6 = por %p312_p0, %p51_p10  ;;  %s3079_s14 = sshll.u32 %s427_s25, 4 }
  0x32   : > { %s3488_s13 = sshll.u32 %s4124_s24, 4  ;;  %s431_s15 = scalar_lea.vmem [#allocation2], %s3079_s14 }
  0x33   : > { %s436_s19 = scalar_lea.hbm %s5068_s0, %s3488_s13  ;;  %s439_s4 = sshll.u32 %s431_s15, 4  ;;  %s440_s4 = int_to_ptr.vmem [resolvable:$true] %s439_s4 }
  0x34   : > { %s437_s3 = sshll.u32 %s436_s19, 4  ;;  %p4331_p7 = pnand %p3647_p2, %p4304_p11  ;;  %s438_s3 = int_to_ptr.hbm [resolvable:$true] %s437_s3 }
  0x35   : > { %s428_s7 = scalar_lea.sflag [#allocation3], %s427_s25  ;;  %s4016_s8 = sshra.s32 %s438_s3, 4  ;;  %s4017_s8 = int_to_ptr.hbm [resolvable:$true] %s4016_s8 }
  0x36   : > { %s4018_s10 = scalar_lea.hbm %s4017_s8, 16  ;;  %p4020_p9 = pneg %p4331_p7 }
  0x37   : > { %p4019_p8 = scmp.ne.s32.totalorder %s4017_s8, %s4018_s10  ;;  %s4023_s16 = scalar_lea.hbm %s5068_s0, 32 }
  0x38   : > { %p4024_p11 = scmp.lt.s32.totalorder %s4017_s8, %s5068_s0  ;;  %p4025_p0 = scmp.lt.s32.totalorder %s4023_s16, %s4018_s10 }
  0x39   : > { %p4021_p10 = pnand %p4020_p9, %p4019_p8 }
  0x3a   : > { %p4026_p2 = por %p4025_p0, %p4024_p11 }
  0x3b   : > { %p4022_p13 = pneg %p4021_p10 }
  0x3d   : > { %p4027_p4 = pnand %p4026_p2, %p4022_p13 }
  0x3f   : > { %4030 = shalt.err (!%p4027_p4)
}
  0x40   : > { %s4138_s25 = smov 128   ;;  %s4139_s19 = smov 8  }
  0x41   : > { %3636 = dma.hbm_to_vmem [thread:$0]  (!%p4331_p7), %s438_s3, 256, %s440_s4, %s428_s7, %s4138_s25, %s4138_s25, %s4139_s19  }
  0x42   : > { %451 = sbr.rel (%p4243_p3) target bundleno = 2125 (0x84d), region = 68  ;;  %s4348_s15 = sand.u32 (!%p4243_p3), 1, %s4116_s22  }
  0x43   : > { %s3083_s8 = sshll.u32 (!%p4243_p3), %s4348_s15, 4  ;;  %s454_s10 = scalar_lea.sflag (!%p4243_p3), [#allocation3], %s4348_s15 }
  0x44   : > { %s4354_s14 = scalar_lea.vmem (!%p4243_p3), [#allocation2], %s3083_s8 }
  0x47   : > { %4091 = dma.done.wait (%p4310_p12), %s454_s10, 256  }
  0x48   : > { %4093 = vsyncadd (%p4310_p12), %s454_s10, 4294967040 }
  0x49   : > { %4095 = dma.done.wait (%p52_p1), [#allocation6], 3088  }
  0x4a   : > { %4097 = vsyncadd (%p52_p1), [#allocation6], 4294964208 }
  0x4b   : > { %4099 = dma.done.wait (%p52_p1), [#allocation9], 1040  }
  0x4c   : > { %4101 = vsyncadd (%p52_p1), [#allocation9], 4294966256 }
  0x4d   : > { %4103 = dma.done.wait (%p52_p1), [#allocation12], 8192  }
  0x4e   : > { %4105 = vsyncadd (%p52_p1), [#allocation12], 4294959104  ;;  %v530_v0 = vld [vmem:[%s4354_s14] sm:$0xff]  ;;  %v531_v1 = vld [vmem:[%s4354_s14 + $0x8] sm:$0xff]  ;;  %v4140_v2 = vmov 128.0   ;;  %s4141_s29 = smov 32  }
  0x4f   : > { %534 = vadd.xlane.f32.xlu0 %v530_v0  ;;  %3776 = vrcp.f32 %v4140_v2  ;;  %v3177_v17 = vld [vmem:[#allocation7 + $0xa8] sm:$0xf]  ;;  %v3511_v18 = vld [vmem:[#allocation7 + $0xb0] sm:$0xf0]  ;;  %v3510_v19 = vld [vmem:[#allocation7 + $0xac] sm:$0xf] }
  0x50   : > { %v3178_v20 = vor.u32 %v3511_v18, %v3177_v17  ;;  %v3179_v21 = vld [vmem:[#allocation7 + $0xb4] sm:$0xf0]  ;;  %v3185_v22 = vld [vmem:[#allocation7 + $0xb0] sm:$0xf]  ;;  %v3512_v23 = vld [vmem:[#allocation7 + $0xb8] sm:$0xf0] }
  0x51   : > { %v3182_v24 = vor.u32 %v3510_v19, %v3179_v21  ;;  %v3186_v25 = vor.u32 %v3512_v23, %v3185_v22  ;;  %v3165_v26 = vld [vmem:[#allocation7 + $0x90] sm:$0xf]  ;;  %v3508_v27 = vld [vmem:[#allocation7 + $0x98] sm:$0xf0]  ;;  %v3507_v28 = vld [vmem:[#allocation7 + $0x94] sm:$0xf] }
  0x52   : > { %752 = vmatpush.bf16.msra.mxu0 %v3178_v20  ;;  %v3166_v29 = vor.u32 %v3508_v27, %v3165_v26  ;;  %v3167_v30 = vld [vmem:[#allocation7 + $0x9c] sm:$0xf0]  ;;  %v3173_v31 = vld [vmem:[#allocation7 + $0x98] sm:$0xf]  ;;  %v3509_v32 = vld [vmem:[#allocation7 + $0xa0] sm:$0xf0] }
  0x53   : > { %766 = vmatpush.bf16.msra.mxu1 %v3182_v24  ;;  %780 = vmatpush.bf16.msra.mxu2 %v3186_v25  ;;  %v3170_v33 = vor.u32 %v3507_v28, %v3167_v30  ;;  %v3174_v34 = vor.u32 %v3509_v32, %v3173_v31  ;;  %v3153_v35 = vld [vmem:[#allocation7 + $0x78] sm:$0xf]  ;;  %v3505_v36 = vld [vmem:[#allocation7 + $0x80] sm:$0xf0]  ;;  %v3504_v37 = vld [vmem:[#allocation7 + $0x7c] sm:$0xf] }
  0x54   : > { %v3154_v38 = vor.u32 %v3505_v36, %v3153_v35  ;;  %v3155_v39 = vld [vmem:[#allocation7 + $0x84] sm:$0xf0]  ;;  %v3161_v40 = vld [vmem:[#allocation7 + $0x80] sm:$0xf]  ;;  %v3506_v41 = vld [vmem:[#allocation7 + $0x88] sm:$0xf0] }
  0x55   : > { %v3777_v3 = vpop.eup %3776  ;;  %v3158_v42 = vor.u32 %v3504_v37, %v3155_v39  ;;  %v3162_v43 = vor.u32 %v3506_v41, %v3161_v40  ;;  %v3141_v44 = vld [vmem:[#allocation7 + $0x60] sm:$0xf]  ;;  %v3502_v45 = vld [vmem:[#allocation7 + $0x68] sm:$0xf0]  ;;  %v3501_v46 = vld [vmem:[#allocation7 + $0x64] sm:$0xf] }
  0x56   : > { %v539_v4 = vmul.f32 128.0, %v3777_v3  ;;  %vm543_vm0 = vweird.f32 %v3777_v3  ;;  %753 = vmatpush.bf16.msra.mxu0 %v3166_v29  ;;  %v3142_v47 = vor.u32 %v3502_v45, %v3141_v44  ;;  %v3143_v48 = vld [vmem:[#allocation7 + $0x6c] sm:$0xf0]  ;;  %v3149_v49 = vld [vmem:[#allocation7 + $0x68] sm:$0xf]  ;;  %s4142_s20 = smov 96  }
  0x57   : > { %536 = vadd.xlane.f32.xlu0 %v531_v1  ;;  %767 = vmatpush.bf16.msra.mxu1 %v3170_v33  ;;  %v3503_v50 = vld [vmem:[#allocation7 + $0x70] sm:$0xf0]  ;;  %v3146_v51 = vor.u32 %v3501_v46, %v3143_v48  ;;  %v3129_v53 = vld [vmem:[#allocation7 + $0x48] sm:$0xf]  ;;  %v3498_v55 = vld [vmem:[#allocation7 + $0x4c] sm:$0xf] }
  0x58   : > { %v540_v5 = vsub.f32 1.0, %v539_v4  ;;  %781 = vmatpush.bf16.msra.mxu2 %v3174_v34  ;;  %v3150_v52 = vor.u32 %v3503_v50, %v3149_v49  ;;  %v3499_v54 = vld [vmem:[#allocation7 + $0x50] sm:$0xf0]  ;;  %v3131_v57 = vld [vmem:[#allocation7 + $0x54] sm:$0xf0]  ;;  %s4143_s4 = smov 64  }
  0x59   : > { %v3130_v56 = vor.u32 %v3499_v54, %v3129_v53  ;;  %v3137_v58 = vld [vmem:[#allocation7 + $0x50] sm:$0xf]  ;;  %v3500_v59 = vld [vmem:[#allocation7 + $0x58] sm:$0xf0]  ;;  %v3134_v60 = vor.u32 %v3498_v55, %v3131_v57  ;;  %v3119_v2 = vld [vmem:[#allocation7 + $0x3c] sm:$0xf0] }
  0x5a   : > { %v541_v6 = vmul.f32 %v3777_v3, %v540_v5  ;;  %754 = vmatpush.bf16.msra.mxu0 %v3154_v38  ;;  %v3138_v61 = vor.u32 %v3500_v59, %v3137_v58  ;;  %v3117_v62 = vld [vmem:[#allocation7 + $0x30] sm:$0xf]  ;;  %v3496_v63 = vld [vmem:[#allocation7 + $0x38] sm:$0xf0]  ;;  %v3497_v4 = vld [vmem:[#allocation7 + $0x40] sm:$0xf0] }
  0x5b   : > { %768 = vmatpush.bf16.msra.mxu1 %v3158_v42  ;;  %v3093_v19 = vld [vmem:[#allocation7] sm:$0xf]  ;;  %v3490_v20 = vld [vmem:[#allocation7 + $0x8] sm:$0xf0]  ;;  %v3489_v21 = vld [vmem:[#allocation7 + $0x4] sm:$0xf] }
  0x5c   : > { %v542_v7 = vadd.f32 %v3777_v3, %v541_v6  ;;  %782 = vmatpush.bf16.msra.mxu2 %v3162_v43  ;;  %v3094_v23 = vor.u32 %v3490_v20, %v3093_v19  ;;  %v3095_v24 = vld [vmem:[#allocation7 + $0xc] sm:$0xf0]  ;;  %v3101_v25 = vld [vmem:[#allocation7 + $0x8] sm:$0xf]  ;;  %v3491_v26 = vld [vmem:[#allocation7 + $0x10] sm:$0xf0] }
  0x5d   : > { %v3098_v28 = vor.u32 %v3489_v21, %v3095_v24  ;;  %v3102_v29 = vor.u32 %v3491_v26, %v3101_v25  ;;  %vm817_vm7 = vcmask 1047556   ;;  %v4145_v24 = vmov 1934713408   ;;  %s528_s3 = scalar_lea.vmem [#allocation14], %s3083_s8 }
  0x5e   : > { %v4374_v8 = vsel %vm543_vm0, %v3777_v3, %v542_v7  ;;  %755 = vmatpush.bf16.msra.mxu0 %v3142_v47  ;;  %v3125_v3 = vld [vmem:[#allocation7 + $0x38] sm:$0xf]  ;;  %v3770_v47 = vld [vmem:[#allocation5] ss:$0 sm:$0xff]  ;;  %v846_v25 = vunpack.c.l.s4 %v4145_v24  ;;  %vm1560_vm8 = vcmask 261120   ;;  %vm1671_vm10 = vcmask 130048  }
  0x5f   : > { %769 = vmatpush.bf16.msra.mxu1 %v3146_v51  ;;  %v3126_v6 = vor.u32 %v3497_v4, %v3125_v3  ;;  %v3105_v7 = vld [vmem:[#allocation7 + $0x18] sm:$0xf]  ;;  %v4144_v3 = vmov 1983009808   ;;  %vm2126_vm12 = vcmask 523264   ;;  %vm2129_vm13 = vcmask 785408  }
  0x60   : > { %783 = vmatpush.bf16.msra.mxu2 %v3150_v52  ;;  %v3771_v52 = vld [vmem:[%s5070_s2] ss:$0 sm:$0xff]  ;;  %v822_v4 = vunpack.c.l.s4 %v4144_v3  ;;  %s2937_s26 = sshll.u32 %s528_s3, 4  ;;  %s2938_s26 = int_to_ptr.vmem [resolvable:$true] %s2937_s26 }
  0x62   : > { %756 = vmatpush.bf16.msra.mxu0 %v3130_v56 }
  0x63   : > { %770 = vmatpush.bf16.msra.mxu1 %v3134_v60 }
  0x64   : > { %784 = vmatpush.bf16.msra.mxu2 %v3138_v61 }
  0x68   : > { %785 = vmatpush.bf16.msra.mxu2 %v3126_v6 }
  0xc2   : > { %v535_v9 = vpop.xlane.xlu0 %534 }
  0xc3   : > { %v545_v10 = vmul.f32 %v4374_v8, %v535_v9  ;;  %v3493_v9 = vld [vmem:[#allocation7 + $0x20] sm:$0xf0] }
  0xc5   : > { %v4377_v11 = vsub.f32 %v530_v0, %v545_v10  ;;  %v3495_v0 = vld [vmem:[#allocation7 + $0x34] sm:$0xf]  ;;  %v3492_v10 = vld [vmem:[#allocation7 + $0x1c] sm:$0xf] }
  0xc6   : > { %v3122_v5 = vor.u32 %v3495_v0, %v3119_v2 }
  0xc7   : > { %v549_v12 = vmul.f32 %v4377_v11, %v4377_v11 }
  0xc8   : > { %771 = vmatpush.bf16.msra.mxu1 %v3122_v5 }
  0xc9   : > { %551 = vadd.xlane.f32.xlu1 %v549_v12  ;;  %v3106_v12 = vor.u32 %v3493_v9, %v3105_v7 }
  0xca   : > { %v537_v13 = vpop.xlane.xlu0 %536 }
  0xcb   : > { %v546_v14 = vmul.f32 %v4374_v8, %v537_v13  ;;  %v3107_v13 = vld [vmem:[#allocation7 + $0x24] sm:$0xf0] }
  0xcc   : > { %v3110_v17 = vor.u32 %v3492_v10, %v3107_v13 }
  0xcd   : > { %v4382_v15 = vsub.f32 %v531_v1, %v546_v14  ;;  %v3118_v1 = vor.u32 %v3496_v63, %v3117_v62  ;;  %v3113_v14 = vld [vmem:[#allocation7 + $0x20] sm:$0xf] }
  0xce   : > { %772 = vmatpush.bf16.msra.mxu1 %v3110_v17 }
  0xcf   : > { %v550_v16 = vmul.f32 %v4382_v15, %v4382_v15  ;;  %757 = vmatpush.bf16.msra.mxu0 %v3118_v1 }
  0xd1   : > { %553 = vadd.xlane.f32.xlu1 %v550_v16  ;;  %v3494_v16 = vld [vmem:[#allocation7 + $0x28] sm:$0xf0] }
  0xd2   : > { %v3114_v18 = vor.u32 %v3494_v16, %v3113_v14  ;;  %773 = vmatpush.bf16.msra.mxu1 %v3098_v28 }
  0xd3   : > { %758 = vmatpush.bf16.msra.mxu0 %v3106_v12  ;;  %v4401_v12 = vunpack.c.0.s8 %v822_v4 }
  0xd4   : > { %786 = vmatpush.bf16.msra.mxu2 %v3114_v18 }
  0xd7   : > { %759 = vmatpush.bf16.msra.mxu0 %v3094_v23 }
  0xd8   : > { %787 = vmatpush.bf16.msra.mxu2 %v3102_v29 }
 0x13c   : > { %v552_v22 = vpop.xlane.xlu1 %551 }
 0x13d   : > { %v555_v27 = vmul.f32 %v552_v22, %v4374_v8 }
 0x13f   : > { %v557_v30 = vadd.f32 1e-05, %v555_v27 }
 0x141   : > { %3778 = vrsqrt.f32 %v557_v30  ;;  %vm565_vm2 = vweird.f32 %v557_v30 }
 0x144   : > { %v554_v31 = vpop.xlane.xlu1 %553 }
 0x145   : > { %v556_v32 = vmul.f32 %v554_v31, %v4374_v8 }
 0x147   : > { %v3779_v33 = vpop.eup %3778  ;;  %v558_v34 = vadd.f32 1e-05, %v556_v32 }
 0x148   : > { %v560_v35 = vmul.f32 %v3779_v33, %v557_v30  ;;  %vm566_vm1 = vweird.f32 %v3779_v33 }
 0x149   : > { %3780 = vrsqrt.f32 %v558_v34  ;;  %vm567_vm3 = vmor %vm565_vm2, %vm566_vm1  ;;  %vm575_vm5 = vweird.f32 %v558_v34 }
 0x14a   : > { %v561_v36 = vmul.f32 %v3779_v33, %v560_v35 }
 0x14c   : > { %v562_v37 = vmul.f32 0.5, %v561_v36  ;;  %v4421_v36 = vunpack.c.0.s8 %v846_v25 }
 0x14e   : > { %v563_v38 = vsub.f32 1.5, %v562_v37 }
 0x14f   : > { %v3781_v39 = vpop.eup %3780 }
 0x150   : > { %v564_v40 = vmul.f32 %v3779_v33, %v563_v38  ;;  %v570_v41 = vmul.f32 %v3781_v39, %v558_v34  ;;  %vm576_vm4 = vweird.f32 %v3781_v39 }
 0x151   : > { %vm577_vm6 = vmor %vm575_vm5, %vm576_vm4 }
 0x152   : > { %v571_v42 = vmul.f32 %v3781_v39, %v570_v41  ;;  %v568_v43 = vsel %vm567_vm3, %v3779_v33, %v564_v40 }
 0x153   : > { %v579_v46 = vmul.f32 %v568_v43, %v4377_v11 }
 0x154   : > { %v572_v44 = vmul.f32 0.5, %v571_v42 }
 0x155   : > { %v584_v51 = vmul.f32 %v3770_v47, %v579_v46 }
 0x156   : > { %v573_v45 = vsub.f32 1.5, %v572_v44 }
 0x157   : > { %v589_v54 = vadd.f32 %v3771_v52, %v584_v51 }
 0x158   : > { %v574_v48 = vmul.f32 %v3781_v39, %v573_v45 }
 0x15a   : > { %v578_v49 = vsel %vm577_vm6, %v3781_v39, %v574_v48 }
 0x15b   : > { %v580_v50 = vmul.f32 %v578_v49, %v4382_v15 }
 0x15d   : > { %v585_v53 = vmul.f32 %v3770_v47, %v580_v50 }
 0x15f   : > { %v590_v55 = vadd.f32 %v3771_v52, %v585_v53 }
 0x161   : > { %v591_v56 = vpack.c.bf16 %v590_v55, %v589_v54 }
 0x163   : > { %760 = vmatmul.bf16.vlgmr.msra.gmra.mxu0 %v591_v56  ;;  %774 = vmatmul.bf16.vlgmr.msra.gmra.mxu1 %v591_v56 }
 0x164   : > { %788 = vmatmul.bf16.vlgmr.msra.gmra.mxu2 %v591_v56 }
 0x1e0   : > { %v761_v11 = vpop.f32.mrf.mxu0  ;;  %v775_v57 = vpop.f32.mrf.mxu1 }
 0x1e1   : > { %v794_v60 = vmul.f32 0.17677669, %v761_v11  ;;  %v1067_v7 = vrot.slane %v775_v57, 4 }
 0x1e3   : > { %v819_v10 = vrot.slane %v794_v60, 4 }
 0x1e8   : > { %v763_v58 = vpop.f32.mrf.mxu0  ;;  %v777_v59 = vpop.f32.mrf.mxu1 }
 0x1e9   : > { %v795_v61 = vmul.f32 0.17677669, %v763_v58  ;;  %v3720_v62 = vpack.i.bf16 %v777_v59, %v775_v57  ;;  %v1123_v9 = vrot.slane %v777_v59, 4 }
 0x1eb   : > { %3721 = vrot.lane.b32.xlu0 %v3720_v62, %s4141_s29  ;;  %3711 = vrot.lane.b32.xlu2 %v3720_v62, %s4142_s20  ;;  %v3725_v15 = vpack.i.bf16 %v795_v61, %v794_v60  ;;  %v875_v17 = vrot.slane %v795_v61, 4 }
 0x1ed   : > { %3726 = vrot.lane.b32.xlu1 %v3725_v15, %s4142_s20 }
 0x1f3   : > { %3716 = vrot.lane.b32.xlu2 %v3720_v62, %s4143_s4 }
 0x1fb   : > { %3731 = vrot.lane.b32.xlu2 %v3725_v15, %s4143_s4 }
 0x203   : > { %3736 = vrot.lane.b32.xlu2 %v3725_v15, %s4141_s29 }
 0x245   : > { %v4399_v63 = vpop.permute.xlu2 %3711 }
 0x246   : > { %v3714_v22 = vunpack.i.h.bf16 %v4399_v63  ;;  %v3713_v23 = vunpack.i.l.bf16 %v4399_v63 }
 0x248   : > { %v1135_v37 = vrot.slane %v3714_v22, 4  ;;  %v1079_v38 = vrot.slane %v3713_v23, 4 }
 0x24d   : > { %v3717_v0 = vpop.permute.xlu2 %3716 }
 0x24e   : > { %v3719_v1 = vunpack.i.h.bf16 %v3717_v0  ;;  %v3718_v2 = vunpack.i.l.bf16 %v3717_v0 }
 0x250   : > { %v1121_v5 = vrot.slane %v3719_v1, 4  ;;  %v1065_v6 = vrot.slane %v3718_v2, 4  ;;  %v1068_v13 = vsel %vm817_vm7, %v3718_v2, %v1067_v7  ;;  %v1124_v14 = vsel %vm817_vm7, %v3719_v1, %v1123_v9 }
 0x251   : > { %v1076_v32 = vperm.slane %v1068_v13, %v4401_v12  ;;  %v1132_v33 = vperm.slane %v1124_v14, %v4401_v12 }
 0x252   : > { %v1122_v18 = vsel %vm817_vm7, %v1121_v5, %v777_v59  ;;  %v1066_v19 = vsel %vm817_vm7, %v1065_v6, %v775_v57 }
 0x253   : > { %v1128_v30 = vperm.slane %v1122_v18, %v4401_v12  ;;  %v1072_v31 = vperm.slane %v1066_v19, %v4401_v12  ;;  %v1103_v43 = vrot.slane %v1076_v32, 4  ;;  %v1159_v44 = vrot.slane %v1132_v33, 4 }
 0x255   : > { %v3732_v16 = vpop.permute.xlu2 %3731  ;;  %v1147_v41 = vrot.slane %v1128_v30, 4  ;;  %v1091_v42 = vrot.slane %v1072_v31, 4 }
 0x256   : > { %v3734_v20 = vunpack.i.h.bf16 %v3732_v16  ;;  %v3733_v21 = vunpack.i.l.bf16 %v3732_v16 }
 0x258   : > { %v873_v26 = vrot.slane %v3734_v20, 4  ;;  %v816_v27 = vrot.slane %v3733_v21, 4  ;;  %v820_v28 = vsel %vm817_vm7, %v3733_v21, %v819_v10  ;;  %v876_v29 = vsel %vm817_vm7, %v3734_v20, %v875_v17 }
 0x259   : > { %v4416_v34 = vperm.slane %v820_v28, %v4401_v12  ;;  %v4419_v35 = vperm.slane %v876_v29, %v4401_v12 }
 0x25a   : > { %v874_v39 = vsel %vm817_vm7, %v873_v26, %v795_v61  ;;  %v818_v40 = vsel %vm817_vm7, %v816_v27, %v794_v60 }
 0x25b   : > { %v4430_v51 = vperm.slane %v874_v39, %v4401_v12  ;;  %v4433_v52 = vperm.slane %v818_v40, %v4401_v12  ;;  %v855_v53 = vrot.slane %v4416_v34, 4  ;;  %v911_v54 = vrot.slane %v4419_v35, 4 }
 0x25d   : > { %v3722_v45 = vpop.permute.xlu0 %3721  ;;  %v4425_v46 = vpop.permute.xlu2 %3736 }
 0x25e   : > { %v3724_v47 = vunpack.i.h.bf16 %v3722_v45  ;;  %v3723_v48 = vunpack.i.l.bf16 %v3722_v45  ;;  %v3739_v49 = vunpack.i.h.bf16 %v4425_v46  ;;  %v3738_v50 = vunpack.i.l.bf16 %v4425_v46 }
 0x25f   : > { %v3727_v55 = vpop.permute.xlu1 %3726 }
 0x260   : > { %v1133_v56 = vrot.slane %v3724_v47, 4  ;;  %v1077_v11 = vrot.slane %v3723_v48, 4  ;;  %v1080_v57 = vsel %vm817_vm7, %v3723_v48, %v1079_v38  ;;  %v1136_v58 = vsel %vm817_vm7, %v3724_v47, %v1135_v37 }
 0x261   : > { %v1088_v59 = vperm.slane %v1080_v57, %v4401_v12  ;;  %v1144_v60 = vperm.slane %v1136_v58, %v4401_v12  ;;  %v885_v61 = vrot.slane %v3739_v49, 4  ;;  %v829_v62 = vrot.slane %v3738_v50, 4 }
 0x262   : > { %v1078_v15 = vsel %vm817_vm7, %v1077_v11, %v3713_v23  ;;  %v1134_v63 = vsel %vm817_vm7, %v1133_v56, %v3714_v22  ;;  %v3729_v0 = vunpack.i.h.bf16 %v3727_v55  ;;  %v3728_v1 = vunpack.i.l.bf16 %v3727_v55 }
 0x263   : > { %v1084_v2 = vperm.slane %v1078_v15, %v4401_v12  ;;  %v1101_v3 = vrot.slane %v1088_v59, 4  ;;  %v1104_v4 = vsel %vm817_vm7, %v1088_v59, %v1103_v43  ;;  %v1140_v5 = vperm.slane %v1134_v63, %v4401_v12 }
 0x264   : > { %v1112_v6 = vperm.slane %v1104_v4, %v4421_v36  ;;  %v1157_v7 = vrot.slane %v1144_v60, 4  ;;  %v1160_v9 = vsel %vm817_vm7, %v1144_v60, %v1159_v44  ;;  %v886_v10 = vsel %vm817_vm7, %v885_v61, %v3729_v0 }
 0x265   : > { %v1089_v13 = vrot.slane %v1084_v2, 4  ;;  %v1092_v14 = vsel %vm817_vm7, %v1084_v2, %v1091_v42  ;;  %v1102_v16 = vsel %vm817_vm7, %v1101_v3, %v1076_v32  ;;  %v1145_v17 = vrot.slane %v1140_v5, 4 }
 0x266   : > { %v1100_v18 = vperm.slane %v1092_v14, %v4421_v36  ;;  %v4457_v19 = vperm.slane %v1102_v16, %v4421_v36  ;;  %v4459_v20 = vrot.slane %v1112_v6, 4  ;;  %v1148_v21 = vsel %vm817_vm7, %v1140_v5, %v1147_v41 }
 0x267   : > { %v1090_v22 = vsel %vm817_vm7, %v1089_v13, %v1072_v31  ;;  %v1146_v23 = vsel %vm817_vm7, %v1145_v17, %v1128_v30  ;;  %v1156_v24 = vperm.slane %v1148_v21, %v4421_v36  ;;  %v1158_v25 = vsel %vm817_vm7, %v1157_v7, %v1132_v33 }
 0x268   : > { %v4467_v26 = vperm.slane %v1090_v22, %v4421_v36  ;;  %v1115_v27 = vrot.slane %v1100_v18, 4  ;;  %v1117_v28 = vrot.slane %v4457_v19, 4  ;;  %v4472_v29 = vsel %vm817_vm7, 0.0, %v4459_v20 }
 0x269   : > { %v4475_v32 = vperm.slane %v1146_v23, %v4421_v36  ;;  %v4478_v31 = vperm.slane %v1158_v25, %v4421_v36  ;;  %v1168_v30 = vperm.slane %v1160_v9, %v4421_v36  ;;  %v4481_v37 = vrot.slane %v1156_v24, 4 }
 0x26a   : > { %v899_v33 = vrot.slane %v4430_v51, 4  ;;  %v843_v38 = vrot.slane %v4433_v52, 4  ;;  %v1113_v39 = vrot.slane %v4467_v26, 4  ;;  %v1116_v40 = vsel %vm817_vm7, 0.0, %v1115_v27 }
 0x26b   : > { %v4488_v41 = vsel %vm817_vm7, 0.0, %v1117_v28  ;;  %v4492_v42 = vsel %vm817_vm7, 0.0, %v4481_v37  ;;  %v4494_v43 = vrot.slane %v1168_v30, 4  ;;  %v1193_v44 = vrot.slane %v4472_v29, 4 }
 0x26c   : > { %v1169_v45 = vrot.slane %v4475_v32, 4  ;;  %v1173_v47 = vrot.slane %v4478_v31, 4  ;;  %v887_v48 = vrot.slane %v3729_v0, 4  ;;  %v892_v55 = vperm.slane %v886_v10, %v4401_v12 }
 0x26d   : > { %v4502_v56 = vsel %vm817_vm7, 0.0, %v4494_v43  ;;  %v1182_v11 = vrot.slane %v1116_v40, 4  ;;  %v830_v57 = vsel %vm817_vm7, %v829_v62, %v3728_v1  ;;  %v831_v58 = vrot.slane %v3728_v1, 4 }
 0x26e   : > { %v1236_v59 = vrot.slane %v4492_v42, 4  ;;  %v888_v60 = vsel %vm817_vm7, %v3739_v49, %v887_v48  ;;  %v897_v61 = vrot.slane %v892_v55, 4  ;;  %v900_v15 = vsel %vm817_vm7, %v892_v55, %v899_v33 }
 0x26f   : > { %v896_v63 = vperm.slane %v888_v60, %v4401_v12  ;;  %v908_v0 = vperm.slane %v900_v15, %v4421_v36  ;;  %v832_v2 = vsel %vm817_vm7, %v3738_v50, %v831_v58  ;;  %v836_v62 = vperm.slane %v830_v57, %v4401_v12 }
 0x270   : > { %v1174_v1 = vsel %vm817_vm7, 0.0, %v1173_v47  ;;  %v1247_v3 = vrot.slane %v4502_v56, 4  ;;  %v898_v49 = vsel %vm817_vm7, %v897_v61, %v4430_v51  ;;  %v840_v4 = vperm.slane %v832_v2, %v4401_v12 }
 0x271   : > { %v4522_v5 = vperm.slane %v898_v49, %v4421_v36  ;;  %v909_v6 = vrot.slane %v896_v63, 4  ;;  %v4524_v7 = vrot.slane %v908_v0, 4  ;;  %v841_v46 = vrot.slane %v836_v62, 4 }
 0x272   : > { %v844_v50 = vsel %vm817_vm7, %v836_v62, %v843_v38  ;;  %v853_v9 = vrot.slane %v840_v4, 4  ;;  %v856_v10 = vsel %vm817_vm7, %v840_v4, %v855_v53  ;;  %v1114_v13 = vsel %vm817_vm7, 0.0, %v1113_v39 }
 0x273   : > { %v842_v51 = vsel %vm817_vm7, %v841_v46, %v4433_v52  ;;  %v852_v14 = vperm.slane %v844_v50, %v4421_v36  ;;  %v912_v16 = vsel %vm817_vm7, %v896_v63, %v911_v54  ;;  %v1170_v17 = vsel %vm817_vm7, 0.0, %v1169_v45 }
 0x274   : > { %v921_v18 = vrot.slane %v4522_v5, 4  ;;  %v4540_v21 = vperm.slane %v842_v51, %v4421_v36  ;;  %v854_v53 = vsel %vm817_vm7, %v853_v9, %v4416_v34  ;;  %v864_v22 = vperm.slane %v856_v10, %v4421_v36 }
 0x275   : > { %v4547_v52 = vsel %vm817_vm7, 0.0, %v4524_v7  ;;  %v4550_v23 = vperm.slane %v854_v53, %v4421_v36  ;;  %v4552_v54 = vrot.slane %v852_v14, 4  ;;  %v910_v24 = vsel %vm817_vm7, %v909_v6, %v4419_v35 }
 0x276   : > { %v865_v25 = vrot.slane %v4540_v21, 4  ;;  %v4557_v28 = vrot.slane %v864_v22, 4  ;;  %v4560_v34 = vperm.slane %v910_v24, %v4421_v36  ;;  %v920_v30 = vperm.slane %v912_v16, %v4421_v36 }
 0x277   : > { %v4565_v33 = vsel %vm817_vm7, 0.0, %v4552_v54  ;;  %v869_v38 = vrot.slane %v4550_v23, 4  ;;  %v1177_v39 = vsel %vm817_vm7, %v1115_v27, %v4467_v26  ;;  %v1183_v35 = vsel %vm817_vm7, %v1182_v11, %v1114_v13 }
 0x278   : > { %v4572_v40 = vsel %vm817_vm7, 0.0, %v921_v18  ;;  %v988_v42 = vrot.slane %v4547_v52, 4  ;;  %v4577_v45 = vsel %vm817_vm7, 0.0, %v4557_v28  ;;  %v925_v47 = vrot.slane %v4560_v34, 4 }
 0x279   : > { %v4581_v48 = vsel %vm817_vm7, 0.0, %v865_v25  ;;  %v4584_v55 = vsel %vm817_vm7, 0.0, %v869_v38  ;;  %v4586_v26 = vrot.slane %v920_v30, 4  ;;  %v1181_v27 = vperm.slane %v1177_v39, %v4401_v12 }
 0x27a   : > { %v934_v56 = vrot.slane %v4565_v33, 4  ;;  %v945_v11 = vrot.slane %v4577_v45, 4  ;;  %v1187_v57 = vperm.slane %v1183_v35, %v4401_v12  ;;  %v1188_v58 = vsel %vm817_vm7, %v4459_v20, %v4457_v19 }
 0x27b   : > { %v4596_v60 = vsel %vm817_vm7, 0.0, %v925_v47  ;;  %v1192_v61 = vperm.slane %v1188_v58, %v4401_v12  ;;  %v1194_v15 = vsel %vm817_vm7, %v1193_v44, %v4488_v41  ;;  %v1201_v63 = vrot.slane %v1181_v27, 4 }
 0x27c   : > { %v1198_v0 = vperm.slane %v1194_v15, %v4401_v12  ;;  %v1199_v2 = vrot.slane %v1187_v57, 4  ;;  %v1231_v62 = vsel %vm817_vm7, %v4481_v37, %v4475_v32  ;;  %v1237_v19 = vsel %vm817_vm7, %v1236_v59, %v1170_v17 }
 0x27d   : > { %v1235_v20 = vperm.slane %v1231_v62, %v4401_v12  ;;  %v1241_v49 = vperm.slane %v1237_v19, %v4401_v12  ;;  %v1242_v29 = vsel %vm817_vm7, %v4494_v43, %v4478_v31  ;;  %v1248_v41 = vsel %vm817_vm7, %v1247_v3, %v1174_v1 }
 0x27e   : > { %v4616_v44 = vsel %vm817_vm7, 0.0, %v4586_v26  ;;  %v1200_v4 = vsel %vm817_vm7, %v1199_v2, %v1181_v27  ;;  %v1211_v6 = vrot.slane %v1198_v0, 4  ;;  %v1252_v32 = vperm.slane %v1248_v41, %v4401_v12 }
 0x27f   : > { %v1206_v37 = vperm.slane %v1200_v4, %v4421_v36  ;;  %v1246_v59 = vperm.slane %v1242_v29, %v4401_v12  ;;  %v1253_v46 = vrot.slane %v1241_v49, 4  ;;  %v1255_v50 = vrot.slane %v1235_v20, 4 }
 0x280   : > { %v1212_v9 = vsel %vm817_vm7, %v1211_v6, %v1192_v61  ;;  %v1265_v31 = vrot.slane %v1252_v32, 4  ;;  %v1202_v43 = vsel %vm817_vm7, %v1187_v57, %v1201_v63  ;;  %v1213_v1 = vrot.slane %v1192_v61, 4 }
 0x281   : > { %v1218_v3 = vperm.slane %v1212_v9, %v4421_v36  ;;  %v1254_v10 = vsel %vm817_vm7, %v1253_v46, %v1235_v20  ;;  %v4627_v13 = vperm.slane %v1202_v43, %v4421_v36  ;;  %v1256_v51 = vsel %vm817_vm7, %v1241_v49, %v1255_v50 }
 0x282   : > { %v1260_v14 = vperm.slane %v1254_v10, %v4421_v36  ;;  %v1266_v16 = vsel %vm817_vm7, %v1265_v31, %v1246_v59  ;;  %v1214_v17 = vsel %vm817_vm7, %v1198_v0, %v1213_v1  ;;  %v4634_v18 = vperm.slane %v1256_v51, %v4421_v36 }
 0x283   : > { %v1223_v53 = vrot.slane %v1218_v3, 4  ;;  %v1272_v22 = vperm.slane %v1266_v16, %v4421_v36  ;;  %v4638_v24 = vperm.slane %v1214_v17, %v4421_v36  ;;  %v1229_v25 = vrot.slane %v4627_v13, 4 }
 0x284   : > { %v999_v30 = vrot.slane %v4616_v44, 4  ;;  %v1267_v38 = vrot.slane %v1246_v59, 4  ;;  %v1225_v39 = vrot.slane %v1206_v37, 4  ;;  %v1279_v35 = vrot.slane %v1260_v14, 4 }
 0x285   : > { %v1224_v47 = vsel %vm817_vm7, %v1223_v53, %v1206_v37  ;;  %v1277_v27 = vrot.slane %v1272_v22, 4  ;;  %v1230_v57 = vsel %vm817_vm7, %v4638_v24, %v1229_v25  ;;  %v1283_v58 = vrot.slane %v4634_v18, 4 }
 0x286   : > { %v1285_v61 = vpack.c.bf16 %v1224_v47, %v1224_v47  ;;  %v1268_v15 = vsel %vm817_vm7, %v1252_v32, %v1267_v38  ;;  %v1291_v63 = vpack.c.bf16 %v1230_v57, %v1230_v57  ;;  %v1226_v0 = vsel %vm817_vm7, %v1218_v3, %v1225_v39 }
 0x287   : > { %v1278_v2 = vsel %vm817_vm7, %v1277_v27, %v1260_v14  ;;  %v4650_v62 = vperm.slane %v1268_v15, %v4421_v36  ;;  %v1280_v19 = vsel %vm817_vm7, %v1272_v22, %v1279_v35  ;;  %v1287_v20 = vpack.c.bf16 %v1226_v0, %v1226_v0 }
 0x288   : > { %v1286_v49 = vpack.c.bf16 %v1278_v2, %v1278_v2  ;;  %v1557_v29 = vunpack.c.l.b16 %v1285_v61  ;;  %v1288_v41 = vpack.c.bf16 %v1280_v19, %v1280_v19  ;;  %v1648_v4 = vunpack.c.l.b16 %v1291_v63 }
 0x289   : > { %v1284_v44 = vsel %vm817_vm7, %v4650_v62, %v1283_v58  ;;  %v1588_v6 = vunpack.c.l.b16 %v1287_v20  ;;  %v929_v32 = vsel %vm817_vm7, %v4552_v54, %v4540_v21  ;;  %v935_v9 = vsel %vm817_vm7, %v934_v56, %v4581_v48 }
 0x28a   : > { %v1558_v37 = vunpack.c.l.b16 %v1286_v49  ;;  %v1292_v59 = vpack.c.bf16 %v1284_v44, %v1284_v44  ;;  %v1589_v46 = vunpack.c.l.b16 %v1288_v41  ;;  %v933_v50 = vperm.slane %v929_v32, %v4401_v12 }
 0x28b   : > { %v940_v31 = vsel %vm817_vm7, %v4557_v28, %v4550_v23  ;;  %v946_v43 = vsel %vm817_vm7, %v945_v11, %v4584_v55  ;;  %v983_v21 = vsel %vm817_vm7, %v4524_v7, %v4522_v5  ;;  %v939_v33 = vperm.slane %v935_v9, %v4401_v12 }
 0x28c   : > { %v1559_v54 = vpack.c.b16 %v1558_v37, %v1557_v29  ;;  %v1649_v1 = vunpack.c.l.b16 %v1292_v59  ;;  %v1590_v3 = vpack.c.b16 %v1589_v46, %v1588_v6  ;;  %v944_v48 = vperm.slane %v940_v31, %v4401_v12 }
 0x28d   : > { %v950_v56 = vperm.slane %v946_v43, %v4401_v12  ;;  %v953_v10 = vrot.slane %v933_v50, 4  ;;  %v987_v23 = vperm.slane %v983_v21, %v4401_v12  ;;  %v951_v11 = vrot.slane %v939_v33, 4 }
 0x28e   : > { %v1565_v28 = vsel %vm1560_vm8, %v1559_v54, 0  ;;  %v1650_v45 = vpack.c.b16 %v1649_v1, %v1648_v4  ;;  %v1595_v55 = vsel %vm1560_vm8, %v1590_v3, 0  ;;  %v989_v7 = vsel %vm817_vm7, %v988_v42, %v4572_v40 }
 0x28f   : > { %1574 = vmatpush.bf16.xpose.msra.mxu3 %v1565_v28  ;;  %v963_v5 = vrot.slane %v950_v56, 4  ;;  %v994_v51 = vsel %vm817_vm7, %v4586_v26, %v4560_v34  ;;  %v1000_v14 = vsel %vm817_vm7, %v999_v30, %v4596_v60  ;;  %v1227_v16 = vrot.slane %v4638_v24, 4 }
 0x290   : > { %v1655_v17 = vsel %vm1560_vm8, %v1650_v45, 0  ;;  %v952_v53 = vsel %vm817_vm7, %v951_v11, %v933_v50  ;;  %v993_v22 = vperm.slane %v989_v7, %v4401_v12  ;;  %v998_v40 = vperm.slane %v994_v51, %v4401_v12 }
 0x291   : > { %1664 = vmatpush.bf16.xpose.msrb.mxu0 %v1655_v17  ;;  %v964_v52 = vsel %vm817_vm7, %v963_v5, %v944_v48  ;;  %v1004_v42 = vperm.slane %v1000_v14, %v4401_v12  ;;  %v1007_v34 = vrot.slane %v987_v23, 4  ;;  %v954_v24 = vsel %vm817_vm7, %v939_v33, %v953_v10 }
 0x292   : > { %v970_v26 = vperm.slane %v964_v52, %v4421_v36  ;;  %v1005_v60 = vrot.slane %v993_v22, 4  ;;  %v965_v25 = vrot.slane %v944_v48, 4  ;;  %v958_v30 = vperm.slane %v952_v53, %v4421_v36 }
 0x293   : > { %v1017_v38 = vrot.slane %v1004_v42, 4  ;;  %v962_v39 = vperm.slane %v954_v24, %v4421_v36  ;;  %v1008_v35 = vsel %vm817_vm7, %v993_v22, %v1007_v34  ;;  %v1281_v61 = vrot.slane %v4650_v62, 4 }
 0x294   : > { %v975_v47 = vrot.slane %v970_v26, 4  ;;  %v1006_v27 = vsel %vm817_vm7, %v1005_v60, %v987_v23  ;;  %v966_v57 = vsel %vm817_vm7, %v950_v56, %v965_v25  ;;  %v1016_v58 = vperm.slane %v1008_v35, %v4421_v36 }
 0x295   : > { %v1018_v15 = vsel %vm817_vm7, %v1017_v38, %v998_v40  ;;  %v974_v63 = vperm.slane %v966_v57, %v4421_v36  ;;  %v981_v0 = vrot.slane %v962_v39, 4  ;;  %v1019_v20 = vrot.slane %v998_v40, 4 }
 0x296   : > { %v976_v2 = vsel %vm817_vm7, %v975_v47, %v958_v30  ;;  %v1024_v19 = vperm.slane %v1018_v15, %v4421_v36  ;;  %v1012_v49 = vperm.slane %v1006_v27, %v4421_v36  ;;  %v1035_v44 = vrot.slane %v1016_v58, 4 }
 0x297   : > { %1604 = vmatpush.bf16.xpose.msrb.mxu3 %v1595_v55  ;;  %v1037_v29 = vpack.c.bf16 %v976_v2, %v976_v2  ;;  %v982_v41 = vsel %vm817_vm7, %v974_v63, %v981_v0  ;;  %v1020_v6 = vsel %vm817_vm7, %v1004_v42, %v1019_v20  ;;  %v1228_v32 = vsel %vm817_vm7, %v1227_v16, %v4627_v13 }
 0x298   : > { %v1029_v4 = vrot.slane %v1024_v19, 4  ;;  %v1043_v62 = vpack.c.bf16 %v982_v41, %v982_v41  ;;  %v1028_v37 = vperm.slane %v1020_v6, %v4421_v36  ;;  %v1282_v59 = vsel %vm817_vm7, %v1281_v61, %v4634_v18 }
 0x299   : > { %v1289_v46 = vpack.c.bf16 %v1228_v32, %v1228_v32  ;;  %v1290_v9 = vpack.c.bf16 %v1282_v59, %v1282_v59  ;;  %v1552_v43 = vunpack.c.l.b16 %v1037_v29  ;;  %v977_v23 = vrot.slane %v958_v30, 4 }
 0x29a   : > { %v1030_v50 = vsel %vm817_vm7, %v1029_v4, %v1012_v49  ;;  %v1036_v21 = vsel %vm817_vm7, %v1028_v37, %v1035_v44  ;;  %v1643_v3 = vunpack.c.l.b16 %v1043_v62  ;;  %v1031_v28 = vrot.slane %v1012_v49, 4 }
 0x29b   : > { %v1038_v31 = vpack.c.bf16 %v1030_v50, %v1030_v50  ;;  %v1618_v54 = vunpack.c.l.b16 %v1289_v46  ;;  %v1044_v1 = vpack.c.bf16 %v1036_v21, %v1036_v21  ;;  %v1619_v33 = vunpack.c.l.b16 %v1290_v9 }
 0x29c   : > { %v978_v55 = vsel %vm817_vm7, %v970_v26, %v977_v23  ;;  %v1032_v11 = vsel %vm817_vm7, %v1024_v19, %v1031_v28  ;;  %v979_v17 = vrot.slane %v974_v63, 4  ;;  %v1033_v53 = vrot.slane %v1028_v37, 4  ;;  %v4736_v37 = vpop.f32.mrf.mxu2 }
 0x29d   : > { %v1553_v48 = vunpack.c.l.b16 %v1038_v31  ;;  %v1644_v56 = vunpack.c.l.b16 %v1044_v1  ;;  %v1620_v13 = vpack.c.b16 %v1619_v33, %v1618_v54  ;;  %v1039_v5 = vpack.c.bf16 %v978_v55, %v978_v55 }
 0x29e   : > { %v1040_v7 = vpack.c.bf16 %v1032_v11, %v1032_v11  ;;  %v980_v22 = vsel %vm817_vm7, %v979_v17, %v962_v39  ;;  %v1034_v52 = vsel %vm817_vm7, %v1033_v53, %v1016_v58  ;;  %v1541_v24 = vlaneseq }
 0x29f   : > { %v1554_v10 = vpack.c.b16 %v1553_v48, %v1552_v43  ;;  %v1645_v45 = vpack.c.b16 %v1644_v56, %v1643_v3  ;;  %v1625_v18 = vsel %vm1560_vm8, %v1620_v13, 0  ;;  %v1583_v51 = vunpack.c.l.b16 %v1039_v5 }
 0x2a0   : > { %v1584_v14 = vunpack.c.l.b16 %v1040_v7  ;;  %v1041_v40 = vpack.c.bf16 %v980_v22, %v980_v22  ;;  %v1042_v42 = vpack.c.bf16 %v1034_v52, %v1034_v52  ;;  %v1542_v25 = vshrl.u32 %v1541_v24, 7 }
 0x2a1   : > { %3187 = vmatmul.msk.bf16.vlgmr.msra.gmra.mxu3 %vm1560_vm8, %v1554_v10  ;;  %3190 = vmatmul.msk.bf16.vlgmr.msrb.gmra.mxu0 %vm1560_vm8, %v1645_v45  ;;  %v1545_v30 = vand.u32 127, %v1541_v24  ;;  %v4146_v38 = vmov -1e+30  }
 0x2a2   : > { %1634 = vmatpush.bf16.xpose.msra.mxu3 %v1625_v18  ;;  %v1585_v16 = vpack.c.b16 %v1584_v14, %v1583_v51  ;;  %v1613_v34 = vunpack.c.l.b16 %v1041_v40  ;;  %v1614_v60 = vunpack.c.l.b16 %v1042_v42  ;;  %v1543_v47 = vadd.s32 8, %v1542_v25 }
 0x2a3   : > { %vm1546_vm9 = vcmp.ge.s32.totalorder %v1542_v25, %v1545_v30 }
 0x2a4   : > { %v1615_v26 = vpack.c.b16 %v1614_v60, %v1613_v34  ;;  %v1548_v35 = vsel %vm1546_vm9, 0.0, %v4146_v38  ;;  %vm1547_vm11 = vcmp.ge.s32.totalorder %v1543_v47, %v1545_v30  ;;  %v4739_v9 = vpop.f32.mrf.mxu2 }
 0x2a5   : > { %v1549_v15 = vsel %vm1547_vm11, 0.0, %v4146_v38  ;;  %v3750_v21 = vpack.i.bf16 %v4739_v9, %v4736_v37 }
 0x2b1   : > { %3188 = vmatmul.msk.bf16.vlgmr.msrb.gmra.mxu3 %vm1560_vm8, %v1585_v16 }
 0x2c1   : > { %3189 = vmatmul.msk.bf16.vlgmr.msra.gmra.mxu3 %vm1560_vm8, %v1615_v26 }
 0x31e   : > { %v1666_v27 = vpop.f32.mrf.mxu0 }
 0x31f   : > { %v4727_v57 = vadd.f32 %v1666_v27, %v1548_v35 }
 0x321   : > { %v1690_v39 = vsel %vm1671_vm10, %v4727_v57, -inf }
 0x322   : > { %1691 = vmax.xlane.f32.xlu1 %v1690_v39 }
 0x324   : > { %v1576_v58 = vpop.f32.mrf.mxu3 }
 0x325   : > { %v1577_v61 = vadd.f32 %v1576_v58, %v1548_v35 }
 0x326   : > { %v1668_v63 = vpop.f32.mrf.mxu0 }
 0x327   : > { %v1672_v0 = vsel %vm1671_vm10, %v1577_v61, -inf  ;;  %v1669_v2 = vadd.f32 %v1668_v63, %v1549_v15 }
 0x328   : > { %1673 = vmax.xlane.f32.xlu2 %v1672_v0 }
 0x329   : > { %v1693_v19 = vsel %vm1671_vm10, %v1669_v2, -inf }
 0x32a   : > { %1694 = vmax.xlane.f32.xlu0 %v1693_v19 }
 0x32c   : > { %v1578_v20 = vpop.f32.mrf.mxu3 }
 0x32d   : > { %v1579_v49 = vadd.f32 %v1578_v20, %v1549_v15 }
 0x32f   : > { %v1675_v29 = vsel %vm1671_vm10, %v1579_v49, -inf }
 0x332   : > { %1676 = vmax.xlane.f32.xlu0 %v1675_v29 }
 0x334   : > { %v1606_v41 = vpop.f32.mrf.mxu3 }
 0x335   : > { %v1607_v44 = vadd.f32 %v1606_v41, %v1548_v35 }
 0x337   : > { %v1678_v4 = vsel %vm1671_vm10, %v1607_v44, -inf }
 0x33a   : > { %1679 = vmax.xlane.f32.xlu0 %v1678_v4 }
 0x33c   : > { %v1608_v6 = vpop.f32.mrf.mxu3 }
 0x33d   : > { %v1609_v62 = vadd.f32 %v1608_v6, %v1549_v15 }
 0x33f   : > { %v1681_v32 = vsel %vm1671_vm10, %v1609_v62, -inf }
 0x340   : > { %1682 = vmax.xlane.f32.xlu2 %v1681_v32 }
 0x344   : > { %v1636_v59 = vpop.f32.mrf.mxu3 }
 0x345   : > { %v1637_v46 = vadd.f32 %v1636_v59, %v1548_v35 }
 0x347   : > { %v1684_v50 = vsel %vm1671_vm10, %v1637_v46, -inf }
 0x348   : > { %1685 = vmax.xlane.f32.xlu1 %v1684_v50  ;;  %v1371_v50 = vrot.slane %v4739_v9, 4 }
 0x34c   : > { %v1638_v31 = vpop.f32.mrf.mxu3 }
 0x34d   : > { %v1639_v43 = vadd.f32 %v1638_v31, %v1549_v15 }
 0x34e   : > { %3751 = vrot.lane.b32.xlu0 %v3750_v21, %s4141_s29 }
 0x34f   : > { %v1687_v54 = vsel %vm1671_vm10, %v1639_v43, -inf }
 0x350   : > { %1688 = vmax.xlane.f32.xlu2 %v1687_v54 }
 0x361   : > { %3746 = vrot.lane.b32.xlu1 %v3750_v21, %s4143_s4 }
 0x368   : > { %3741 = vrot.lane.b32.xlu2 %v3750_v21, %s4142_s20 }
 0x395   : > { %v1692_v51 = vpop.xlane.xlu1 %1691 }
 0x396   : > { %v1702_v25 = vsub.f32 %v4727_v57, %v1692_v51 }
 0x398   : > { %v1716_v39 = vmul.f32 1.442695, %v1702_v25 }
 0x39b   : > { %v1674_v1 = vpop.xlane.xlu2 %1673 }
 0x39c   : > { %v1696_v3 = vsub.f32 %v1577_v61, %v1674_v1 }
 0x39d   : > { %v1695_v48 = vpop.xlane.xlu0 %1694 }
 0x39e   : > { %v1704_v33 = vmul.f32 1.442695, %v1696_v3  ;;  %v1703_v11 = vsub.f32 %v1669_v2, %v1695_v48 }
 0x3a0   : > { %3782 = vpow2.f32 %v1704_v33  ;;  %v1718_v14 = vmul.f32 1.442695, %v1703_v11 }
 0x3a5   : > { %v1677_v13 = vpop.xlane.xlu0 %1676 }
 0x3a6   : > { %v4747_v56 = vpop.eup %3782  ;;  %v1697_v10 = vsub.f32 %v1579_v49, %v1677_v13 }
 0x3a7   : > { %v1720_v23 = vsel %vm1671_vm10, %v4747_v56, 0.0 }
 0x3a8   : > { %1721 = vadd.xlane.f32.xlu2 %v1720_v23  ;;  %v1706_v28 = vmul.f32 1.442695, %v1697_v10 }
 0x3aa   : > { %3784 = vpow2.f32 %v1706_v28 }
 0x3ad   : > { %v1680_v45 = vpop.xlane.xlu0 %1679 }
 0x3ae   : > { %v1698_v18 = vsub.f32 %v1607_v44, %v1680_v45 }
 0x3b0   : > { %v4751_v55 = vpop.eup %3784  ;;  %v1708_v5 = vmul.f32 1.442695, %v1698_v18 }
 0x3b1   : > { %v1723_v7 = vsel %vm1671_vm10, %v4751_v55, 0.0 }
 0x3b2   : > { %3786 = vpow2.f32 %v1708_v5  ;;  %1724 = vadd.xlane.f32.xlu0 %v1723_v7 }
 0x3b3   : > { %3788 = vpow2.f32 %v1718_v14  ;;  %v1683_v53 = vpop.xlane.xlu2 %1682 }
 0x3b4   : > { %v1699_v40 = vsub.f32 %v1609_v62, %v1683_v53 }
 0x3b6   : > { %v1710_v60 = vmul.f32 1.442695, %v1699_v40 }
 0x3b8   : > { %v4755_v16 = vpop.eup %3786 }
 0x3b9   : > { %v1726_v17 = vsel %vm1671_vm10, %v4755_v16, 0.0  ;;  %v4759_v34 = vpop.eup %3788 }
 0x3ba   : > { %1727 = vadd.xlane.f32.xlu0 %v1726_v17  ;;  %v1741_v26 = vsel %vm1671_vm10, %v4759_v34, 0.0 }
 0x3bb   : > { %v1686_v22 = vpop.xlane.xlu1 %1685 }
 0x3bc   : > { %v1700_v52 = vsub.f32 %v1637_v46, %v1686_v22  ;;  %v1315_v46 = vrot.slane %v4736_v37, 4 }
 0x3be   : > { %v1712_v42 = vmul.f32 1.442695, %v1700_v52 }
 0x3c0   : > { %3790 = vpow2.f32 %v1712_v42  ;;  %v3752_v47 = vpop.permute.xlu0 %3751 }
 0x3c1   : > { %3792 = vpow2.f32 %v1710_v60  ;;  %v3754_v58 = vunpack.i.h.bf16 %v3752_v47  ;;  %v3753_v61 = vunpack.i.l.bf16 %v3752_v47 }
 0x3c2   : > { %1742 = vadd.xlane.f32.xlu0 %v1741_v26 }
 0x3c3   : > { %v1689_v24 = vpop.xlane.xlu2 %1688  ;;  %v1381_v19 = vrot.slane %v3754_v58, 4  ;;  %v1325_v29 = vrot.slane %v3753_v61, 4 }
 0x3c4   : > { %v1701_v30 = vsub.f32 %v1639_v43, %v1689_v24 }
 0x3c6   : > { %v4764_v38 = vpop.eup %3790  ;;  %v1714_v35 = vmul.f32 1.442695, %v1701_v30 }
 0x3c7   : > { %v1732_v27 = vsel %vm1671_vm10, %v4764_v38, 0.0  ;;  %v4768_v63 = vpop.eup %3792 }
 0x3c8   : > { %3794 = vpow2.f32 %v1714_v35  ;;  %1733 = vadd.xlane.f32.xlu1 %v1732_v27  ;;  %v1729_v41 = vsel %vm1671_vm10, %v4768_v63, 0.0 }
 0x3c9   : > { %3796 = vpow2.f32 %v1716_v39 }
 0x3cb   : > { %v3742_v15 = vpop.permute.xlu2 %3741 }
 0x3cc   : > { %v3744_v0 = vunpack.i.h.bf16 %v3742_v15  ;;  %v3743_v57 = vunpack.i.l.bf16 %v3742_v15 }
 0x3ce   : > { %v4770_v2 = vpop.eup %3794  ;;  %v1383_v20 = vrot.slane %v3744_v0, 4  ;;  %v1327_v49 = vrot.slane %v3743_v57, 4  ;;  %v1382_v4 = vsel %vm817_vm7, %v1381_v19, %v3744_v0  ;;  %v1326_v32 = vsel %vm817_vm7, %v1325_v29, %v3743_v57 }
 0x3cf   : > { %v1735_v44 = vsel %vm1671_vm10, %v4770_v2, 0.0  ;;  %v4780_v59 = vpop.eup %3796  ;;  %v1388_v31 = vperm.slane %v1382_v4, %v4401_v12  ;;  %v1332_v1 = vperm.slane %v1326_v32, %v4401_v12 }
 0x3d0   : > { %v1328_v6 = vsel %vm817_vm7, %v3753_v61, %v1327_v49  ;;  %1730 = vadd.xlane.f32.xlu1 %v1729_v41  ;;  %1736 = vadd.xlane.f32.xlu2 %v1735_v44  ;;  %v1384_v62 = vsel %vm817_vm7, %v3754_v58, %v1383_v20  ;;  %v1738_v48 = vsel %vm1671_vm10, %v4780_v59, 0.0 }
 0x3d1   : > { %v1336_v43 = vperm.slane %v1328_v6, %v4401_v12  ;;  %v1392_v54 = vperm.slane %v1384_v62, %v4401_v12  ;;  %v1393_v45 = vrot.slane %v1388_v31, 4  ;;  %v1337_v51 = vrot.slane %v1332_v1, 4 }
 0x3d3   : > { %v3747_v21 = vpop.permute.xlu1 %3746  ;;  %v1349_v18 = vrot.slane %v1336_v43, 4  ;;  %v1405_v7 = vrot.slane %v1392_v54, 4 }
 0x3d4   : > { %v3749_v3 = vunpack.i.h.bf16 %v3747_v21  ;;  %v3748_v33 = vunpack.i.l.bf16 %v3747_v21 }
 0x3d6   : > { %v1369_v13 = vrot.slane %v3749_v3, 4  ;;  %v1372_v10 = vsel %vm817_vm7, %v3749_v3, %v1371_v50  ;;  %v1313_v23 = vrot.slane %v3748_v33, 4  ;;  %v1316_v28 = vsel %vm817_vm7, %v3748_v33, %v1315_v46 }
 0x3d7   : > { %v1380_v11 = vperm.slane %v1372_v10, %v4401_v12  ;;  %v1324_v5 = vperm.slane %v1316_v28, %v4401_v12 }
 0x3d8   : > { %v1370_v14 = vsel %vm817_vm7, %v1369_v13, %v4739_v9  ;;  %v1314_v17 = vsel %vm817_vm7, %v1313_v23, %v4736_v37  ;;  %1739 = vadd.xlane.f32.xlu2 %v1738_v48 }
 0x3d9   : > { %v1376_v53 = vperm.slane %v1370_v14, %v4401_v12  ;;  %v1407_v22 = vrot.slane %v1380_v11, 4  ;;  %v1320_v52 = vperm.slane %v1314_v17, %v4401_v12  ;;  %v1350_v40 = vsel %vm817_vm7, %v1349_v18, %v1324_v5 }
 0x3da   : > { %v1351_v42 = vrot.slane %v1324_v5, 4  ;;  %v1356_v60 = vperm.slane %v1350_v40, %v4421_v36  ;;  %v1406_v26 = vsel %vm817_vm7, %v1405_v7, %v1380_v11 }
 0x3db   : > { %v1395_v24 = vrot.slane %v1376_v53, 4  ;;  %v1338_v25 = vsel %vm817_vm7, %v1337_v51, %v1320_v52  ;;  %v1339_v9 = vrot.slane %v1320_v52, 4  ;;  %v1394_v30 = vsel %vm817_vm7, %v1393_v45, %v1376_v53 }
 0x3dc   : > { %v1344_v37 = vperm.slane %v1338_v25, %v4421_v36  ;;  %v1352_v35 = vsel %vm817_vm7, %v1336_v43, %v1351_v42  ;;  %v1365_v47 = vrot.slane %v1356_v60, 4  ;;  %v1400_v27 = vperm.slane %v1394_v30, %v4421_v36 }
 0x3dd   : > { %v1340_v39 = vsel %vm817_vm7, %v1332_v1, %v1339_v9  ;;  %v1360_v58 = vperm.slane %v1352_v35, %v4421_v36  ;;  %v1396_v61 = vsel %vm817_vm7, %v1388_v31, %v1395_v24  ;;  %v1408_v15 = vsel %vm817_vm7, %v1392_v54, %v1407_v22 }
 0x3de   : > { %v1348_v0 = vperm.slane %v1340_v39, %v4421_v36  ;;  %v1361_v57 = vrot.slane %v1344_v37, 4  ;;  %v1404_v19 = vperm.slane %v1396_v61, %v4421_v36  ;;  %v1412_v49 = vperm.slane %v1406_v26, %v4421_v36 }
 0x3df   : > { %v1367_v20 = vrot.slane %v1360_v58, 4  ;;  %v1416_v29 = vperm.slane %v1408_v15, %v4421_v36  ;;  %v1417_v41 = vrot.slane %v1400_v27, 4  ;;  %v1366_v6 = vsel %vm817_vm7, 0.0, %v1365_v47 }
 0x3e0   : > { %v1362_v44 = vsel %vm817_vm7, 0.0, %v1361_v57  ;;  %v1363_v4 = vrot.slane %v1348_v0, 4  ;;  %v1419_v62 = vrot.slane %v1404_v19, 4  ;;  %v1421_v50 = vrot.slane %v1412_v49, 4 }
 0x3e1   : > { %v1368_v32 = vsel %vm817_vm7, 0.0, %v1367_v20  ;;  %v1418_v46 = vsel %vm817_vm7, 0.0, %v1417_v41  ;;  %v1423_v31 = vrot.slane %v1416_v29, 4  ;;  %v1436_v1 = vsel %vm817_vm7, %v1367_v20, %v1356_v60 }
 0x3e2   : > { %v1364_v43 = vsel %vm817_vm7, 0.0, %v1363_v4  ;;  %v1420_v21 = vsel %vm817_vm7, 0.0, %v1419_v62  ;;  %v1425_v54 = vsel %vm817_vm7, %v1363_v4, %v1344_v37  ;;  %v1422_v3 = vsel %vm817_vm7, 0.0, %v1421_v50 }
 0x3e3   : > { %v1424_v33 = vsel %vm817_vm7, 0.0, %v1423_v31  ;;  %v1429_v48 = vperm.slane %v1425_v54, %v4401_v12  ;;  %v1430_v13 = vrot.slane %v1364_v43, 4  ;;  %v1440_v10 = vperm.slane %v1436_v1, %v4401_v12 }
 0x3e4   : > { %v1441_v23 = vrot.slane %v1368_v32, 4  ;;  %v1479_v28 = vsel %vm817_vm7, %v1419_v62, %v1400_v27  ;;  %v1484_v45 = vrot.slane %v1420_v21, 4  ;;  %v1490_v5 = vsel %vm817_vm7, %v1423_v31, %v1412_v49 }
 0x3e5   : > { %v1431_v18 = vsel %vm817_vm7, %v1430_v13, %v1362_v44  ;;  %v1483_v11 = vperm.slane %v1479_v28, %v4401_v12  ;;  %v1495_v7 = vrot.slane %v1424_v33, 4  ;;  %v1461_v14 = vrot.slane %v1440_v10, 4 }
 0x3e6   : > { %v1442_v51 = vsel %vm817_vm7, %v1441_v23, %v1366_v6  ;;  %v1485_v17 = vsel %vm817_vm7, %v1484_v45, %v1418_v46  ;;  %v1494_v53 = vperm.slane %v1490_v5, %v4401_v12  ;;  %v1435_v40 = vperm.slane %v1431_v18, %v4401_v12 }
 0x3e7   : > { %v1446_v22 = vperm.slane %v1442_v51, %v4401_v12  ;;  %v1496_v52 = vsel %vm817_vm7, %v1495_v7, %v1422_v3  ;;  %v1449_v42 = vrot.slane %v1429_v48, 4  ;;  %v1489_v24 = vperm.slane %v1485_v17, %v4401_v12 }
 0x3e8   : > { %v1500_v60 = vperm.slane %v1496_v52, %v4401_v12  ;;  %v1515_v26 = vrot.slane %v1494_v53, 4  ;;  %v1503_v25 = vrot.slane %v1483_v11, 4  ;;  %v1447_v37 = vrot.slane %v1435_v40, 4 }
 0x3e9   : > { %v1450_v9 = vsel %vm817_vm7, %v1435_v40, %v1449_v42  ;;  %v1462_v30 = vsel %vm817_vm7, %v1446_v22, %v1461_v14  ;;  %v1459_v35 = vrot.slane %v1446_v22, 4  ;;  %v1501_v29 = vrot.slane %v1489_v24, 4 }
 0x3ea   : > { %v1458_v47 = vperm.slane %v1450_v9, %v4421_v36  ;;  %v1470_v27 = vperm.slane %v1462_v30, %v4421_v36  ;;  %v1504_v39 = vsel %vm817_vm7, %v1489_v24, %v1503_v25  ;;  %v1516_v58 = vsel %vm817_vm7, %v1500_v60, %v1515_v26 }
 0x3eb   : > { %v1512_v61 = vperm.slane %v1504_v39, %v4421_v36  ;;  %v1524_v15 = vperm.slane %v1516_v58, %v4421_v36  ;;  %v1448_v0 = vsel %vm817_vm7, %v1447_v37, %v1429_v48  ;;  %v1460_v57 = vsel %vm817_vm7, %v1459_v35, %v1440_v10 }
 0x3ec   : > { %v1475_v19 = vrot.slane %v1470_v27, 4  ;;  %v1454_v20 = vperm.slane %v1448_v0, %v4421_v36  ;;  %v1466_v49 = vperm.slane %v1460_v57, %v4421_v36  ;;  %v1513_v44 = vrot.slane %v1500_v60, 4 }
 0x3ed   : > { %v1529_v41 = vrot.slane %v1524_v15, 4  ;;  %v1477_v4 = vrot.slane %v1458_v47, 4  ;;  %v1531_v6 = vrot.slane %v1512_v61, 4  ;;  %v1502_v50 = vsel %vm817_vm7, %v1501_v29, %v1483_v11 }
 0x3ee   : > { %v1476_v62 = vsel %vm817_vm7, %v1475_v19, %v1458_v47  ;;  %v1471_v32 = vrot.slane %v1466_v49, 4  ;;  %v1473_v46 = vrot.slane %v1454_v20, 4  ;;  %v1508_v21 = vperm.slane %v1502_v50, %v4421_v36 }
 0x3ef   : > { %v1530_v31 = vsel %vm817_vm7, %v1529_v41, %v1512_v61  ;;  %v1537_v43 = vpack.c.bf16 %v1476_v62, %v1476_v62  ;;  %v1514_v54 = vsel %vm817_vm7, %v1513_v44, %v1494_v53  ;;  %v1478_v48 = vsel %vm817_vm7, %v1470_v27, %v1477_v4 }
 0x3f0   : > { %v1538_v1 = vpack.c.bf16 %v1530_v31, %v1530_v31  ;;  %v1472_v3 = vsel %vm817_vm7, %v1471_v32, %v1454_v20  ;;  %v1520_v33 = vperm.slane %v1514_v54, %v4421_v36  ;;  %v1527_v10 = vrot.slane %v1508_v21, 4 }
 0x3f1   : > { %v1831_v13 = vunpack.c.l.b16 %v1537_v43  ;;  %v1533_v23 = vpack.c.bf16 %v1472_v3, %v1472_v3  ;;  %v1532_v28 = vsel %vm817_vm7, %v1524_v15, %v1531_v6  ;;  %v1539_v11 = vpack.c.bf16 %v1478_v48, %v1478_v48 }
 0x3f2   : > { %v1832_v45 = vunpack.c.l.b16 %v1538_v1  ;;  %v1525_v18 = vrot.slane %v1520_v33, 4  ;;  %v1540_v5 = vpack.c.bf16 %v1532_v28, %v1532_v28  ;;  %v1474_v7 = vsel %vm817_vm7, %v1466_v49, %v1473_v46 }
 0x3f3   : > { %v1528_v51 = vsel %vm817_vm7, %v1520_v33, %v1527_v10  ;;  %v1859_v53 = vunpack.c.l.b16 %v1539_v11  ;;  %v1775_v40 = vunpack.c.l.b16 %v1533_v23  ;;  %v1535_v42 = vpack.c.bf16 %v1474_v7, %v1474_v7 }
 0x3f4   : > { %v1833_v14 = vpack.c.b16 %v1832_v45, %v1831_v13  ;;  %v1526_v17 = vsel %vm817_vm7, %v1525_v18, %v1508_v21  ;;  %v1860_v22 = vunpack.c.l.b16 %v1540_v5  ;;  %v1536_v60 = vpack.c.bf16 %v1528_v51, %v1528_v51 }
 0x3f5   : > { %v1534_v52 = vpack.c.bf16 %v1526_v17, %v1526_v17  ;;  %v1803_v25 = vunpack.c.l.b16 %v1535_v42 }
 0x3f6   : > { %1845 = vmatpush.bf16.msrb.mxu3 %v1833_v14  ;;  %v1861_v26 = vpack.c.b16 %v1860_v22, %v1859_v53  ;;  %v1804_v9 = vunpack.c.l.b16 %v1536_v60 }
 0x3f7   : > { %v1776_v24 = vunpack.c.l.b16 %v1534_v52 }
 0x3f8   : > { %1873 = vmatpush.bf16.msra.mxu0 %v1861_v26  ;;  %v1805_v37 = vpack.c.b16 %v1804_v9, %v1803_v25 }
 0x3f9   : > { %v1777_v30 = vpack.c.b16 %v1776_v24, %v1775_v40 }
 0x3fb   : > { %1789 = vmatpush.bf16.msrb.mxu2 %v1777_v30 }
 0x3ff   : > { %1817 = vmatpush.bf16.msra.mxu2 %v1805_v37 }
 0x41b   : > { %v1722_v35 = vpop.xlane.xlu2 %1721 }
 0x41c   : > { %3798 = vrcp.f32 %v1722_v35 }
 0x422   : > { %v3799_v27 = vpop.eup %3798 }
 0x423   : > { %v1752_v39 = vmul.f32 %v3799_v27, %v4747_v56 }
 0x425   : > { %v1725_v47 = vpop.xlane.xlu0 %1724  ;;  %v1760_v61 = vpack.c.bf16 %v1752_v39, %v1752_v39 }
 0x426   : > { %3800 = vrcp.f32 %v1725_v47 }
 0x427   : > { %v1770_v57 = vunpack.c.l.b16 %v1760_v61 }
 0x42c   : > { %v3801_v58 = vpop.eup %3800 }
 0x42d   : > { %v1753_v15 = vmul.f32 %v3801_v58, %v4751_v55  ;;  %v1728_v49 = vpop.xlane.xlu0 %1727 }
 0x42e   : > { %3802 = vrcp.f32 %v1728_v49 }
 0x42f   : > { %v1761_v0 = vpack.c.bf16 %v1753_v15, %v1753_v15 }
 0x431   : > { %v1771_v19 = vunpack.c.l.b16 %v1761_v0 }
 0x433   : > { %v1772_v20 = vpack.c.b16 %v1771_v19, %v1770_v57 }
 0x434   : > { %v3803_v6 = vpop.eup %3802 }
 0x435   : > { %3191 = vmatmul.msk.bf16.vlgmr.msrb.gmra.mxu2 %vm1671_vm10, %v1772_v20  ;;  %v1743_v41 = vpop.xlane.xlu0 %1742  ;;  %v1754_v55 = vmul.f32 %v3803_v6, %v4755_v16 }
 0x437   : > { %v1762_v50 = vpack.c.bf16 %v1754_v55, %v1754_v55 }
 0x439   : > { %v1798_v48 = vunpack.c.l.b16 %v1762_v50 }
 0x43b   : > { %v1734_v29 = vpop.xlane.xlu1 %1733 }
 0x43c   : > { %3804 = vrcp.f32 %v1734_v29 }
 0x442   : > { %v3805_v56 = vpop.eup %3804 }
 0x443   : > { %v1731_v44 = vpop.xlane.xlu1 %1730  ;;  %v1737_v4 = vpop.xlane.xlu2 %1736  ;;  %v1756_v62 = vmul.f32 %v3805_v56, %v4764_v38 }
 0x444   : > { %3806 = vrcp.f32 %v1731_v44 }
 0x445   : > { %3808 = vrcp.f32 %v1737_v4  ;;  %v1764_v54 = vpack.c.bf16 %v1756_v62, %v1756_v62 }
 0x446   : > { %3810 = vrcp.f32 %v1743_v41 }
 0x447   : > { %v1826_v16 = vunpack.c.l.b16 %v1764_v54 }
 0x44a   : > { %v3807_v32 = vpop.eup %3806 }
 0x44b   : > { %v3809_v46 = vpop.eup %3808  ;;  %v1755_v31 = vmul.f32 %v3807_v32, %v4768_v63  ;;  %v1740_v43 = vpop.xlane.xlu2 %1739 }
 0x44c   : > { %v3811_v21 = vpop.eup %3810  ;;  %v1757_v1 = vmul.f32 %v3809_v46, %v4770_v2  ;;  %3812 = vrcp.f32 %v1740_v43 }
 0x44d   : > { %v1763_v3 = vpack.c.bf16 %v1755_v31, %v1755_v31  ;;  %v1759_v13 = vmul.f32 %v3811_v21, %v4759_v34 }
 0x44e   : > { %v1765_v33 = vpack.c.bf16 %v1757_v1, %v1757_v1 }
 0x44f   : > { %v1799_v10 = vunpack.c.l.b16 %v1763_v3  ;;  %v1767_v18 = vpack.c.bf16 %v1759_v13, %v1759_v13 }
 0x450   : > { %v1827_v23 = vunpack.c.l.b16 %v1765_v33 }
 0x451   : > { %v1800_v38 = vpack.c.b16 %v1799_v10, %v1798_v48  ;;  %v1855_v11 = vunpack.c.l.b16 %v1767_v18 }
 0x452   : > { %v3813_v28 = vpop.eup %3812  ;;  %v1828_v45 = vpack.c.b16 %v1827_v23, %v1826_v16 }
 0x453   : > { %v1758_v63 = vmul.f32 %v3813_v28, %v4780_v59  ;;  %3192 = vmatmul.msk.bf16.vlgmr.msra.gmra.mxu2 %vm1671_vm10, %v1800_v38 }
 0x454   : > { %3193 = vmatmul.msk.bf16.vlgmr.msrb.gmra.mxu3 %vm1671_vm10, %v1828_v45 }
 0x455   : > { %v1766_v2 = vpack.c.bf16 %v1758_v63, %v1758_v63 }
 0x457   : > { %v1854_v5 = vunpack.c.l.b16 %v1766_v2 }
 0x459   : > { %v1856_v7 = vpack.c.b16 %v1855_v11, %v1854_v5 }
 0x45b   : > { %3194 = vmatmul.msk.bf16.vlgmr.msra.gmra.mxu0 %vm1671_vm10, %v1856_v7 }
 0x4b8   : > { %v1791_v34 = vpop.f32.mrf.mxu2 }
 0x4b9   : > { %v1882_v14 = vrot.slane %v1791_v34, 4 }
 0x4c0   : > { %v1793_v51 = vpop.f32.mrf.mxu2 }
 0x4c1   : > { %v1938_v57 = vrot.slane %v1793_v51, 4 }
 0x4d6   : > { %v1819_v17 = vpop.f32.mrf.mxu2 }
 0x4d7   : > { %v1894_v53 = vrot.slane %v1819_v17, 4  ;;  %v1847_v22 = vpop.f32.mrf.mxu3 }
 0x4d8   : > { %v1880_v52 = vrot.slane %v1847_v22, 4  ;;  %v1883_v40 = vsel %vm817_vm7, %v1847_v22, %v1882_v14  ;;  %v1875_v59 = vpop.f32.mrf.mxu0 }
 0x4d9   : > { %v1891_v42 = vperm.slane %v1883_v40, %v4401_v12  ;;  %v1892_v60 = vrot.slane %v1875_v59, 4  ;;  %v1895_v26 = vsel %vm817_vm7, %v1875_v59, %v1894_v53 }
 0x4da   : > { %v1881_v24 = vsel %vm817_vm7, %v1880_v52, %v1791_v34  ;;  %v1903_v25 = vperm.slane %v1895_v26, %v4401_v12 }
 0x4db   : > { %v1887_v9 = vperm.slane %v1881_v24, %v4401_v12  ;;  %v1918_v30 = vrot.slane %v1891_v42, 4  ;;  %v1893_v37 = vsel %vm817_vm7, %v1892_v60, %v1819_v17 }
 0x4dc   : > { %v1899_v35 = vperm.slane %v1893_v37, %v4401_v12  ;;  %v1916_v47 = vrot.slane %v1903_v25, 4 }
 0x4dd   : > { %v1906_v27 = vrot.slane %v1887_v9, 4  ;;  %v1919_v39 = vsel %vm817_vm7, %v1903_v25, %v1918_v30 }
 0x4de   : > { %v1904_v58 = vrot.slane %v1899_v35, 4  ;;  %v1917_v61 = vsel %vm817_vm7, %v1916_v47, %v1891_v42  ;;  %v1927_v15 = vperm.slane %v1919_v39, %v4421_v36  ;;  %v1821_v0 = vpop.f32.mrf.mxu2 }
 0x4df   : > { %v1907_v19 = vsel %vm817_vm7, %v1899_v35, %v1906_v27  ;;  %v1923_v20 = vperm.slane %v1917_v61, %v4421_v36  ;;  %v1950_v49 = vrot.slane %v1821_v0, 4  ;;  %v1849_v29 = vpop.f32.mrf.mxu3 }
 0x4e0   : > { %v1905_v41 = vsel %vm817_vm7, %v1904_v58, %v1887_v9  ;;  %v1915_v44 = vperm.slane %v1907_v19, %v4421_v36  ;;  %v1934_v4 = vrot.slane %v1927_v15, 4  ;;  %v1936_v6 = vrot.slane %v1849_v29, 4  ;;  %v1877_v56 = vpop.f32.mrf.mxu0 }
 0x4e1   : > { %v1911_v55 = vperm.slane %v1905_v41, %v4421_v36  ;;  %v1932_v62 = vrot.slane %v1923_v20, 4  ;;  %v1939_v32 = vsel %vm817_vm7, %v1849_v29, %v1938_v57  ;;  %v1948_v46 = vrot.slane %v1877_v56, 4 }
 0x4e2   : > { %v1930_v50 = vrot.slane %v1915_v44, 4  ;;  %v1935_v31 = vsel %vm817_vm7, 0.0, %v1934_v4  ;;  %v2003_v43 = vsel %vm817_vm7, %v1934_v4, %v1923_v20  ;;  %v1937_v21 = vsel %vm817_vm7, %v1936_v6, %v1793_v51 }
 0x4e3   : > { %v1928_v54 = vrot.slane %v1911_v55, 4  ;;  %v1933_v1 = vsel %vm817_vm7, 0.0, %v1932_v62  ;;  %v2007_v3 = vperm.slane %v2003_v43, %v4401_v12  ;;  %v2008_v33 = vrot.slane %v1935_v31, 4 }
 0x4e4   : > { %v1931_v48 = vsel %vm817_vm7, 0.0, %v1930_v50  ;;  %v1992_v13 = vsel %vm817_vm7, %v1930_v50, %v1911_v55  ;;  %v1943_v10 = vperm.slane %v1937_v21, %v4401_v12  ;;  %v1947_v16 = vperm.slane %v1939_v32, %v4401_v12 }
 0x4e5   : > { %v1997_v23 = vrot.slane %v1931_v48, 4  ;;  %v2009_v38 = vsel %vm817_vm7, %v2008_v33, %v1933_v1  ;;  %v2028_v28 = vrot.slane %v2007_v3, 4  ;;  %v1949_v45 = vsel %vm817_vm7, %v1948_v46, %v1821_v0 }
 0x4e6   : > { %v2013_v18 = vperm.slane %v2009_v38, %v4401_v12  ;;  %v1962_v63 = vrot.slane %v1943_v10, 4  ;;  %v1974_v2 = vrot.slane %v1947_v16, 4  ;;  %v1951_v11 = vsel %vm817_vm7, %v1877_v56, %v1950_v49 }
 0x4e7   : > { %v1955_v5 = vperm.slane %v1949_v45, %v4401_v12  ;;  %v1959_v7 = vperm.slane %v1951_v11, %v4401_v12  ;;  %v1929_v34 = vsel %vm817_vm7, 0.0, %v1928_v54  ;;  %v1996_v51 = vperm.slane %v1992_v13, %v4401_v12 }
 0x4e8   : > { %v1998_v14 = vsel %vm817_vm7, %v1997_v23, %v1929_v34  ;;  %v2029_v17 = vsel %vm817_vm7, %v2013_v18, %v2028_v28  ;;  %v2026_v53 = vrot.slane %v2013_v18, 4 }
 0x4e9   : > { %v1960_v22 = vrot.slane %v1955_v5, 4  ;;  %v1963_v52 = vsel %vm817_vm7, %v1955_v5, %v1962_v63  ;;  %v1972_v40 = vrot.slane %v1959_v7, 4  ;;  %v1975_v59 = vsel %vm817_vm7, %v1959_v7, %v1974_v2 }
 0x4ea   : > { %v1971_v42 = vperm.slane %v1963_v52, %v4421_v36  ;;  %v1983_v60 = vperm.slane %v1975_v59, %v4421_v36  ;;  %v2002_v26 = vperm.slane %v1998_v14, %v4401_v12  ;;  %v2016_v24 = vrot.slane %v1996_v51, 4 }
 0x4eb   : > { %v1961_v25 = vsel %vm817_vm7, %v1960_v22, %v1943_v10  ;;  %v1973_v9 = vsel %vm817_vm7, %v1972_v40, %v1947_v16  ;;  %v2027_v30 = vsel %vm817_vm7, %v2026_v53, %v2007_v3  ;;  %v2037_v58 = vperm.slane %v2029_v17, %v4421_v36 }
 0x4ec   : > { %v1967_v37 = vperm.slane %v1961_v25, %v4421_v36  ;;  %v1979_v35 = vperm.slane %v1973_v9, %v4421_v36  ;;  %v1986_v47 = vrot.slane %v1971_v42, 4  ;;  %v1990_v27 = vrot.slane %v1983_v60, 4  ;;  %v3518_v25 = vld [vmem:[#allocation8 + $0x28] sm:$0xff]  ;;  %v3517_v9 = vld [vmem:[#allocation8 + $0x20] sm:$0xff] }
 0x4ed   : > { %v2017_v39 = vsel %vm817_vm7, %v2002_v26, %v2016_v24  ;;  %v2014_v61 = vrot.slane %v2002_v26, 4  ;;  %v2033_v15 = vperm.slane %v2027_v30, %v4421_v36  ;;  %v2042_v10 = vrot.slane %v2037_v58, 4  ;;  %v3520_v26 = vld [vmem:[#allocation8 + $0x38] sm:$0xff]  ;;  %v3519_v24 = vld [vmem:[#allocation8 + $0x30] sm:$0xff] }
 0x4ee   : > { %v1984_v0 = vrot.slane %v1967_v37, 4  ;;  %v1987_v57 = vsel %vm817_vm7, 0.0, %v1986_v47  ;;  %v1988_v19 = vrot.slane %v1979_v35, 4  ;;  %v1991_v20 = vsel %vm817_vm7, 0.0, %v1990_v27  ;;  %2201 = vmatpush.bf16.msrb.mxu1 %v3520_v26  ;;  %v3516_v30 = vld [vmem:[#allocation8 + $0x18] sm:$0xff] }
 0x4ef   : > { %v2046_v49 = vsel %vm817_vm7, %v1986_v47, %v1967_v37  ;;  %v2051_v29 = vrot.slane %v1987_v57, 4  ;;  %v2057_v41 = vsel %vm817_vm7, %v1990_v27, %v1979_v35  ;;  %v2062_v44 = vrot.slane %v1991_v20, 4  ;;  %v3515_v37 = vld [vmem:[#allocation8 + $0x10] sm:$0xff]  ;;  %v3514_v35 = vld [vmem:[#allocation8 + $0x8] sm:$0xff]  ;;  %v3513_v47 = vld [vmem:[#allocation8] sm:$0xff] }
 0x4f0   : > { %v1989_v4 = vsel %vm817_vm7, 0.0, %v1988_v19  ;;  %v2061_v6 = vperm.slane %v2057_v41, %v4401_v12  ;;  %v1985_v56 = vsel %vm817_vm7, 0.0, %v1984_v0  ;;  %v2025_v55 = vperm.slane %v2017_v39, %v4421_v36  ;;  %v3335_v26 = vld [vmem:[#allocation11 + $0xd8] sm:$0xf0] }
 0x4f1   : > { %v2063_v62 = vsel %vm817_vm7, %v2062_v44, %v1989_v4  ;;  %v2050_v32 = vperm.slane %v2046_v49, %v4401_v12  ;;  %v2052_v46 = vsel %vm817_vm7, %v2051_v29, %v1985_v56  ;;  %v2015_v50 = vsel %vm817_vm7, %v2014_v61, %v1996_v51 }
 0x4f2   : > { %v2067_v31 = vperm.slane %v2063_v62, %v4401_v12  ;;  %v2082_v43 = vrot.slane %v2061_v6, 4  ;;  %v2056_v21 = vperm.slane %v2052_v46, %v4401_v12  ;;  %v2021_v1 = vperm.slane %v2015_v50, %v4421_v36  ;;  %2202 = vmatpush.bf16.msrb.mxu1 %v3519_v24  ;;  %v3834_v46 = vld [vmem:[%s4354_s14] sm:$0xff] }
 0x4f3   : > { %v2070_v54 = vrot.slane %v2050_v32, 4  ;;  %v2038_v3 = vrot.slane %v2033_v15, 4  ;;  %v2044_v38 = vrot.slane %v2025_v55, 4  ;;  %v2043_v34 = vsel %vm817_vm7, %v2042_v10, %v2025_v55  ;;  %v3772_v55 = vld [vmem:[%s5073_s5] ss:$0 sm:$0xff] }
 0x4f4   : > { %v2083_v33 = vsel %vm817_vm7, %v2067_v31, %v2082_v43  ;;  %v2068_v48 = vrot.slane %v2056_v21, 4  ;;  %v2080_v13 = vrot.slane %v2067_v31, 4  ;;  %v2040_v2 = vrot.slane %v2021_v1, 4 }
 0x4f5   : > { %v2071_v16 = vsel %vm817_vm7, %v2056_v21, %v2070_v54  ;;  %v2091_v23 = vperm.slane %v2083_v33, %v4421_v36  ;;  %v2039_v18 = vsel %vm817_vm7, %v2038_v3, %v2021_v1  ;;  %v2045_v22 = vsel %vm817_vm7, %v2037_v58, %v2044_v38  ;;  %v3835_v21 = vld [vmem:[%s4354_s14 + $0x8] sm:$0xff]  ;;  %v3341_v38 = vld [vmem:[#allocation11 + $0xe0] sm:$0xf]  ;;  %s3585_s14 = sshll.u32 %s4238_s28, 4  ;;  %s2925_s28 = scalar_lea.sflag [#allocation4], %s4348_s15 }
 0x4f6   : > { %v2079_v28 = vperm.slane %v2071_v16, %v4421_v36  ;;  %v2069_v45 = vsel %vm817_vm7, %v2068_v48, %v2050_v32  ;;  %v2081_v12 = vsel %vm817_vm7, %v2080_v13, %v2061_v6  ;;  %v2041_v59 = vsel %vm817_vm7, %v2033_v15, %v2040_v2  ;;  %2203 = vmatpush.bf16.msrb.mxu1 %v3518_v25  ;;  %v3552_v2 = vld [vmem:[#allocation11 + $0xf4] sm:$0xf0]  ;;  %v3309_v25 = vld [vmem:[#allocation11 + $0xa0] sm:$0xf] }
 0x4f7   : > { %v2096_v63 = vrot.slane %v2091_v23, 4  ;;  %v2075_v11 = vperm.slane %v2069_v45, %v4421_v36  ;;  %v2087_v5 = vperm.slane %v2081_v12, %v4421_v36  ;;  %v3549_v45 = vld [vmem:[#allocation11 + $0xe4] sm:$0xf] }
 0x4f8   : > { %v2098_v7 = vrot.slane %v2079_v28, 4 }
 0x4f9   : > { %v2097_v51 = vsel %vm817_vm7, %v2096_v63, %v2079_v28  ;;  %v2092_v14 = vrot.slane %v2087_v5, 4  ;;  %v2094_v17 = vrot.slane %v2075_v11, 4  ;;  %v3551_v28 = vld [vmem:[#allocation11 + $0xec] sm:$0xf0]  ;;  %v3349_v63 = vld [vmem:[#allocation11 + $0xe8] sm:$0xf] }
 0x4fa   : > { %v3760_v53 = vpack.i.bf16 %v2097_v51, %v2043_v34  ;;  %v2099_v52 = vsel %vm817_vm7, %v2091_v23, %v2098_v7  ;;  %2204 = vmatpush.bf16.msrb.mxu1 %v3517_v9  ;;  %v3342_v12 = vor.u32 %v3551_v28, %v3341_v38  ;;  %v3550_v7 = vld [vmem:[#allocation11 + $0xec] sm:$0xf]  ;;  %v3351_v34 = vld [vmem:[#allocation11 + $0xf8] sm:$0xf0]  ;;  %v3543_v9 = vld [vmem:[#allocation11 + $0xac] sm:$0xf0] }
 0x4fb   : > { %v3765_v40 = vpack.i.bf16 %v2099_v52, %v2045_v22  ;;  %v2095_v42 = vsel %vm817_vm7, %v2087_v5, %v2094_v17  ;;  %v2093_v60 = vsel %vm817_vm7, %v2092_v14, %v2075_v11  ;;  %v3350_v5 = vor.u32 %v3552_v2, %v3349_v63  ;;  %v3325_v14 = vld [vmem:[#allocation11 + $0xc0] sm:$0xf]  ;;  %v3547_v17 = vld [vmem:[#allocation11 + $0xcc] sm:$0xf0]  ;;  %v3327_v52 = vld [vmem:[#allocation11 + $0xd0] sm:$0xf0] }
 0x4fc   : > { %3761 = vrot.lane.b32.xlu2 %v3760_v53, %s4143_s4  ;;  %v3755_v36 = vpack.i.bf16 %v2095_v42, %v2041_v59  ;;  %2472 = vmatpush.bf16.msrb.mxu2 %v3342_v12  ;;  %v3354_v51 = vor.u32 %v3550_v7, %v3351_v34  ;;  %v3545_v53 = vld [vmem:[#allocation11 + $0xc4] sm:$0xf]  ;;  %v3326_v22 = vor.u32 %v3547_v17, %v3325_v14  ;;  %v3548_v59 = vld [vmem:[#allocation11 + $0xd4] sm:$0xf0]  ;;  %v3261_v28 = vld [vmem:[#allocation11 + $0x40] sm:$0xf] }
 0x4fd   : > { %3766 = vrot.lane.b32.xlu0 %v3765_v40, %s4142_s20  ;;  %2500 = vmatpush.bf16.msrb.mxu0 %v3350_v5  ;;  %v3333_v40 = vld [vmem:[#allocation11 + $0xc8] sm:$0xf]  ;;  %v3330_v42 = vor.u32 %v3545_v53, %v3327_v52  ;;  %v3529_v12 = vld [vmem:[#allocation11 + $0x44] sm:$0xf]  ;;  %v3263_v2 = vld [vmem:[#allocation11 + $0x50] sm:$0xf0] }
 0x4fe   : > { %3756 = vrot.lane.b32.xlu1 %v3755_v36, %s4141_s29  ;;  %2205 = vmatpush.bf16.msrb.mxu1 %v3516_v30  ;;  %v3546_v36 = vld [vmem:[#allocation11 + $0xcc] sm:$0xf]  ;;  %v3541_v30 = vld [vmem:[#allocation11 + $0xa4] sm:$0xf]  ;;  %v3532_v5 = vld [vmem:[#allocation11 + $0x54] sm:$0xf0]  ;;  %v3266_v34 = vor.u32 %v3529_v12, %v3263_v2 }
 0x4ff   : > { %v3338_v24 = vor.u32 %v3546_v36, %v3335_v26  ;;  %v3530_v14 = vld [vmem:[#allocation11 + $0x4c] sm:$0xf]  ;;  %v3271_v17 = vld [vmem:[#allocation11 + $0x58] sm:$0xf0]  ;;  %v3245_v53 = vld [vmem:[#allocation11 + $0x20] sm:$0xf] }
 0x500   : > { %2473 = vmatpush.bf16.msrb.mxu2 %v3326_v22  ;;  %v3274_v22 = vor.u32 %v3530_v14, %v3271_v17  ;;  %v3527_v52 = vld [vmem:[#allocation11 + $0x2c] sm:$0xf0]  ;;  %v3253_v36 = vld [vmem:[#allocation11 + $0x28] sm:$0xf]  ;;  %v3528_v26 = vld [vmem:[#allocation11 + $0x34] sm:$0xf0] }
 0x501   : > { %v3584_v2 = vld [vmem:[#allocation13 + $0xf8] sm:$0xff]  ;;  %v3559_v14 = vld [vmem:[#allocation13 + $0x30] sm:$0xff]  ;;  %s5102_s20 = sld [smem:[#allocation26_spill]] }
 0x502   : > { %2206 = vmatpush.bf16.msrb.mxu1 %v3515_v37  ;;  %v3310_v37 = vor.u32 %v3543_v9, %v3309_v25  ;;  %v3254_v25 = vor.u32 %v3528_v26, %v3253_v36  ;;  %v3526_v9 = vld [vmem:[#allocation11 + $0x2c] sm:$0xf]  ;;  %v3567_v17 = vld [vmem:[#allocation13 + $0x70] sm:$0xff]  ;;  %v3565_v36 = vld [vmem:[#allocation13 + $0x60] sm:$0xff] }
 0x503   : > { %v3571_v26 = vld [vmem:[#allocation13 + $0x90] sm:$0xff] }
 0x504   : > { %2474 = vmatpush.bf16.msrb.mxu2 %v3310_v37  ;;  %v3229_v37 = vld [vmem:[#allocation11] sm:$0xf] }
 0x506   : > { %2207 = vmatpush.bf16.msrb.mxu1 %v3514_v35  ;;  %v3311_v35 = vld [vmem:[#allocation11 + $0xb0] sm:$0xf0] }
 0x507   : > { %s2936_s4 = scalar_lea.hbm %s5102_s20, %s3585_s14  ;;  %s4066_s25 = scalar_lea.hbm %s5102_s20, 32 }
 0x508   : > { %s2939_s13 = sshll.u32 %s2936_s4, 4  ;;  %s2940_s13 = int_to_ptr.hbm [resolvable:$true] %s2939_s13 }
 0x509   : > { %s4060_s8 = sshra.s32 %s2940_s13, 4  ;;  %s4061_s8 = int_to_ptr.hbm [resolvable:$true] %s4060_s8 }
 0x50a   : > { %2208 = vmatpush.bf16.msrb.mxu1 %v3513_v47  ;;  %v3317_v47 = vld [vmem:[#allocation11 + $0xa8] sm:$0xf]  ;;  %s4062_s16 = scalar_lea.hbm %s4061_s8, 16  ;;  %p4067_p12 = scmp.lt.s32.totalorder %s4061_s8, %s5102_s20 }
 0x50b   : > { %p4063_p1 = scmp.ne.s32.totalorder %s4061_s8, %s4062_s16  ;;  %p4068_p7 = scmp.lt.s32.totalorder %s4066_s25, %s4062_s16 }
 0x50d   : > { %p4064_p3 = pnand %p4063_p1, %p4317_p5  ;;  %p4069_p8 = por %p4068_p7, %p4067_p12 }
 0x50e   : > { %2514 = vmatpush.bf16.msra.mxu1 %v3354_v51 }
 0x50f   : > { %p4065_p4 = pneg %p4064_p3 }
 0x511   : > { %p4070_p9 = pnand %p4069_p8, %p4065_p4 }
 0x512   : > { %2515 = vmatpush.bf16.msra.mxu1 %v3338_v24 }
 0x556   : > { %v3762_v27 = vpop.permute.xlu2 %3761 }
 0x557   : > { %v3764_v0 = vunpack.i.h.bf16 %v3762_v27  ;;  %v3763_v57 = vunpack.i.l.bf16 %v3762_v27  ;;  %v3544_v27 = vld [vmem:[#allocation11 + $0xb4] sm:$0xf0] }
 0x56f   : > { %v3767_v39 = vpop.permute.xlu0 %3766 }
 0x570   : > { %v3757_v58 = vpop.permute.xlu1 %3756  ;;  %v3769_v19 = vunpack.i.h.bf16 %v3767_v39  ;;  %v3768_v20 = vunpack.i.l.bf16 %v3767_v39  ;;  %v3314_v39 = vor.u32 %v3541_v30, %v3311_v35  ;;  %v3255_v30 = vld [vmem:[#allocation11 + $0x38] sm:$0xf0] }
 0x571   : > { %v3759_v61 = vunpack.i.h.bf16 %v3757_v58  ;;  %v3758_v15 = vunpack.i.l.bf16 %v3757_v58  ;;  %v3318_v58 = vor.u32 %v3544_v27, %v3317_v47  ;;  %v3258_v35 = vor.u32 %v3526_v9, %v3255_v30  ;;  %v3523_v47 = vld [vmem:[#allocation11 + $0xc] sm:$0xf0]  ;;  %v3521_v27 = vld [vmem:[#allocation11 + $0x4] sm:$0xf]  ;;  %v3556_v9 = vld [vmem:[#allocation13 + $0x18] sm:$0xff] }
 0x572   : > { %v3564_v30 = vld [vmem:[#allocation13 + $0x58] sm:$0xff] }
 0x573   : > { %v2124_v49 = vsel %vm1560_vm8, %v2039_v18, %v3758_v15  ;;  %v2125_v29 = vsel %vm1560_vm8, %v2093_v60, %v3759_v61  ;;  %v3343_v18 = vld [vmem:[#allocation11 + $0xf0] sm:$0xf0]  ;;  %v3334_v60 = vor.u32 %v3548_v59, %v3333_v40  ;;  %v3542_v61 = vld [vmem:[#allocation11 + $0xac] sm:$0xf]  ;;  %v3319_v15 = vld [vmem:[#allocation11 + $0xb8] sm:$0xf0] }
 0x574   : > { %v2127_v41 = vsel %vm2126_vm12, %v2124_v49, %v3763_v57  ;;  %v2128_v44 = vsel %vm2126_vm12, %v2125_v29, %v3764_v0  ;;  %v3346_v11 = vor.u32 %v3549_v45, %v3343_v18  ;;  %v3322_v0 = vor.u32 %v3542_v61, %v3319_v15  ;;  %v3293_v57 = vld [vmem:[#allocation11 + $0x80] sm:$0xf]  ;;  %v3295_v29 = vld [vmem:[#allocation11 + $0x90] sm:$0xf0]  ;;  %v3531_v45 = vld [vmem:[#allocation11 + $0x4c] sm:$0xf0] }
 0x575   : > { %v2130_v4 = vsel %vm2129_vm13, %v2127_v41, %v3768_v20  ;;  %v2131_v6 = vsel %vm2129_vm13, %v2128_v44, %v3769_v19  ;;  %2501 = vmatpush.bf16.msrb.mxu0 %v3334_v60  ;;  %v3539_v19 = vld [vmem:[#allocation11 + $0x8c] sm:$0xf0]  ;;  %v3537_v20 = vld [vmem:[#allocation11 + $0x84] sm:$0xf]  ;;  %v3301_v41 = vld [vmem:[#allocation11 + $0x88] sm:$0xf]  ;;  %v3262_v63 = vor.u32 %v3531_v45, %v3261_v28  ;;  %v3246_v60 = vor.u32 %v3527_v52, %v3245_v53 }
 0x576   : > { %v2132_v56 = vpack.c.bf16 %v2131_v6, %v2130_v4  ;;  %2486 = vmatpush.bf16.msra.mxu3 %v3346_v11  ;;  %2516 = vmatpush.bf16.msra.mxu1 %v3322_v0  ;;  %v3294_v49 = vor.u32 %v3539_v19, %v3293_v57  ;;  %v3540_v44 = vld [vmem:[#allocation11 + $0x94] sm:$0xf0]  ;;  %v3298_v4 = vor.u32 %v3537_v20, %v3295_v29  ;;  %v3269_v11 = vld [vmem:[#allocation11 + $0x48] sm:$0xf]  ;;  %v3525_v40 = vld [vmem:[#allocation11 + $0x24] sm:$0xf] }
 0x577   : > { %v3302_v6 = vor.u32 %v3540_v44, %v3301_v41  ;;  %v3270_v51 = vor.u32 %v3532_v5, %v3269_v11  ;;  %v3247_v59 = vld [vmem:[#allocation11 + $0x30] sm:$0xf0]  ;;  %v3524_v61 = vld [vmem:[#allocation11 + $0x14] sm:$0xf0]  ;;  %v3522_v15 = vld [vmem:[#allocation11 + $0xc] sm:$0xf]  ;;  %v3230_v0 = vor.u32 %v3523_v47, %v3229_v37 }
 0x578   : > { %2209 = vmatmul.bf16.vlgmr.msrb.gmra.mxu1 %v2132_v56  ;;  %v3538_v56 = vld [vmem:[#allocation11 + $0x8c] sm:$0xf]  ;;  %2475 = vmatpush.bf16.msrb.mxu2 %v3294_v49  ;;  %v3250_v24 = vor.u32 %v3525_v40, %v3247_v59  ;;  %v3239_v57 = vld [vmem:[#allocation11 + $0x18] sm:$0xf0]  ;;  %v3575_v11 = vld [vmem:[#allocation13 + $0xb0] sm:$0xff] }
 0x579   : > { %2502 = vmatpush.bf16.msrb.mxu0 %v3318_v58  ;;  %v3237_v58 = vld [vmem:[#allocation11 + $0x8] sm:$0xf]  ;;  %v3242_v41 = vor.u32 %v3522_v15, %v3239_v57  ;;  %v3774_v28 = vld [vmem:[#allocation10] ss:$0 sm:$0xff]  ;;  %v3583_v5 = vld [vmem:[#allocation13 + $0xf0] sm:$0xff] }
 0x57a   : > { %2487 = vmatpush.bf16.msra.mxu3 %v3330_v42  ;;  %v3238_v49 = vor.u32 %v3524_v61, %v3237_v58  ;;  %v3573_v53 = vld [vmem:[#allocation13 + $0xa0] sm:$0xff]  ;;  %v3558_v52 = vld [vmem:[#allocation13 + $0x28] sm:$0xff]  ;;  %v3572_v59 = vld [vmem:[#allocation13 + $0x98] sm:$0xff] }
 0x57b   : > { %v3566_v40 = vld [vmem:[#allocation13 + $0x68] sm:$0xff]  ;;  %v3563_v58 = vld [vmem:[#allocation13 + $0x50] sm:$0xff] }
 0x57c   : > { %v3570_v47 = vld [vmem:[#allocation13 + $0x88] sm:$0xff] }
 0x57d   : > { %2503 = vmatpush.bf16.msrb.mxu0 %v3302_v6 }
 0x57e   : > { %2488 = vmatpush.bf16.msra.mxu3 %v3314_v39  ;;  %v3231_v39 = vld [vmem:[#allocation11 + $0x10] sm:$0xf0] }
 0x57f   : > { %v3234_v20 = vor.u32 %v3521_v27, %v3231_v39  ;;  %v3578_v27 = vld [vmem:[#allocation13 + $0xc8] sm:$0xff]  ;;  %v3555_v39 = vld [vmem:[#allocation13 + $0x10] sm:$0xff] }
 0x582   : > { %2489 = vmatpush.bf16.msra.mxu3 %v3298_v4 }
 0x5f5   : > { %v2210_v62 = vpop.f32.mrf.mxu1 }
 0x5f6   : > { %v2211_v32 = vadd.f32 %v3772_v55, %v2210_v62 }
 0x5f8   : > { %v4965_v50 = vadd.f32 %v3834_v46, %v2211_v32  ;;  %v3277_v32 = vld [vmem:[#allocation11 + $0x60] sm:$0xf]  ;;  %v3535_v46 = vld [vmem:[#allocation11 + $0x6c] sm:$0xf0] }
 0x5fa   : > { %2219 = vadd.xlane.f32.xlu1 %v4965_v50 }
 0x5fd   : > { %v2212_v31 = vpop.f32.mrf.mxu1 }
 0x5fe   : > { %v2213_v43 = vadd.f32 %v3772_v55, %v2212_v31  ;;  %v3303_v55 = vld [vmem:[#allocation11 + $0x98] sm:$0xf0]  ;;  %v3533_v31 = vld [vmem:[#allocation11 + $0x64] sm:$0xf] }
 0x5ff   : > { %v3306_v62 = vor.u32 %v3538_v56, %v3303_v55 }
 0x600   : > { %v4969_v54 = vadd.f32 %v3835_v21, %v2213_v43  ;;  %v3278_v43 = vor.u32 %v3535_v46, %v3277_v32  ;;  %v3279_v21 = vld [vmem:[#allocation11 + $0x70] sm:$0xf0] }
 0x601   : > { %2517 = vmatpush.bf16.msra.mxu1 %v3306_v62 }
 0x602   : > { %2221 = vadd.xlane.f32.xlu0 %v4969_v54  ;;  %2476 = vmatpush.bf16.msrb.mxu2 %v3278_v43 }
 0x606   : > { %2477 = vmatpush.bf16.msrb.mxu2 %v3262_v63 }
 0x60a   : > { %2478 = vmatpush.bf16.msrb.mxu2 %v3246_v60  ;;  %v3557_v60 = vld [vmem:[#allocation13 + $0x20] sm:$0xff] }
 0x60e   : > { %2479 = vmatpush.bf16.msrb.mxu2 %v3230_v0 }
 0x66d   : > { %v2220_v1 = vpop.xlane.xlu1 %2219 }
 0x66e   : > { %v2223_v3 = vmul.f32 %v2220_v1, %v4374_v8  ;;  %v3285_v1 = vld [vmem:[#allocation11 + $0x68] sm:$0xf] }
 0x670   : > { %v4974_v33 = vsub.f32 %v4965_v50, %v2223_v3  ;;  %v3536_v3 = vld [vmem:[#allocation11 + $0x74] sm:$0xf0] }
 0x672   : > { %v2227_v48 = vmul.f32 %v4974_v33, %v4974_v33 }
 0x674   : > { %2229 = vadd.xlane.f32.xlu2 %v2227_v48  ;;  %v3282_v48 = vor.u32 %v3533_v31, %v3279_v21 }
 0x675   : > { %v2222_v13 = vpop.xlane.xlu0 %2221 }
 0x676   : > { %v2224_v10 = vmul.f32 %v2222_v13, %v4374_v8  ;;  %v3286_v13 = vor.u32 %v3536_v3, %v3285_v1  ;;  %2490 = vmatpush.bf16.msra.mxu3 %v3282_v48  ;;  %v3773_v48 = vld [vmem:[%s5074_s6] ss:$0 sm:$0xff] }
 0x678   : > { %v4980_v16 = vsub.f32 %v4969_v54, %v2224_v10  ;;  %v3534_v10 = vld [vmem:[#allocation11 + $0x6c] sm:$0xf]  ;;  %2504 = vmatpush.bf16.msrb.mxu0 %v3286_v13 }
 0x67a   : > { %v2228_v23 = vmul.f32 %v4980_v16, %v4980_v16  ;;  %2491 = vmatpush.bf16.msra.mxu3 %v3266_v34  ;;  %v3574_v34 = vld [vmem:[#allocation13 + $0xa8] sm:$0xff] }
 0x67c   : > { %2231 = vadd.xlane.f32.xlu1 %v2228_v23  ;;  %v3287_v23 = vld [vmem:[#allocation11 + $0x78] sm:$0xf0]  ;;  %2505 = vmatpush.bf16.msrb.mxu0 %v3270_v51  ;;  %v3582_v51 = vld [vmem:[#allocation13 + $0xe8] sm:$0xff] }
 0x67d   : > { %v3290_v38 = vor.u32 %v3534_v10, %v3287_v23 }
 0x67e   : > { %2492 = vmatpush.bf16.msra.mxu3 %v3250_v24  ;;  %v4994_v24 = vld [vmem:[%s5077_s9] sm:$0xf] }
 0x67f   : > { %2518 = vmatpush.bf16.msra.mxu1 %v3290_v38  ;;  %v2306_v37 = vperm.slane %v4994_v24, 2 }
 0x680   : > { %2506 = vmatpush.bf16.msrb.mxu0 %v3254_v25  ;;  %v3579_v25 = vld [vmem:[#allocation13 + $0xd0] sm:$0xff] }
 0x682   : > { %2493 = vmatpush.bf16.msra.mxu3 %v3234_v20  ;;  %v3577_v20 = vld [vmem:[#allocation13 + $0xc0] sm:$0xff] }
 0x683   : > { %2519 = vmatpush.bf16.msra.mxu1 %v3274_v22  ;;  %v3581_v22 = vld [vmem:[#allocation13 + $0xe0] sm:$0xff] }
 0x684   : > { %2507 = vmatpush.bf16.msrb.mxu0 %v3238_v49  ;;  %v2304_v49 = vperm.slane %v4994_v24, 0 }
 0x687   : > { %2520 = vmatpush.bf16.msra.mxu1 %v3258_v35  ;;  %v2307_v35 = vperm.slane %v4994_v24, 3 }
 0x68b   : > { %2521 = vmatpush.bf16.msra.mxu1 %v3242_v41 }
 0x68f   : > { %2906 = vmatpush.bf16.msrb.mxu1 %v3584_v2 }
 0x693   : > { %2907 = vmatpush.bf16.msrb.mxu1 %v3583_v5 }
 0x697   : > { %2908 = vmatpush.bf16.msrb.mxu1 %v3582_v51 }
 0x69b   : > { %2909 = vmatpush.bf16.msrb.mxu1 %v3581_v22 }
 0x6e7   : > { %v2230_v18 = vpop.xlane.xlu2 %2229 }
 0x6e8   : > { %v2233_v7 = vmul.f32 %v2230_v18, %v4374_v8 }
 0x6ea   : > { %v2235_v42 = vadd.f32 1e-05, %v2233_v7  ;;  %v3560_v7 = vld [vmem:[#allocation13 + $0x38] sm:$0xff] }
 0x6eb   : > { %2864 = vmatpush.bf16.msra.mxu2 %v3560_v7 }
 0x6ec   : > { %3814 = vrsqrt.f32 %v2235_v42  ;;  %vm2243_vm15 = vweird.f32 %v2235_v42 }
 0x6ef   : > { %v2232_v19 = vpop.xlane.xlu1 %2231  ;;  %2865 = vmatpush.bf16.msra.mxu2 %v3559_v14 }
 0x6f0   : > { %v2234_v29 = vmul.f32 %v2232_v19, %v4374_v8  ;;  %v3569_v19 = vld [vmem:[#allocation13 + $0x80] sm:$0xff] }
 0x6f2   : > { %v3815_v44 = vpop.eup %3814  ;;  %v2236_v4 = vadd.f32 1e-05, %v2234_v29  ;;  %v2305_v29 = vperm.slane %v4994_v24, 1 }
 0x6f3   : > { %v2238_v6 = vmul.f32 %v3815_v44, %v2235_v42  ;;  %vm2244_vm14 = vweird.f32 %v3815_v44  ;;  %2866 = vmatpush.bf16.msra.mxu2 %v3558_v52  ;;  %v3580_v42 = vld [vmem:[#allocation13 + $0xd8] sm:$0xff] }
 0x6f4   : > { %3816 = vrsqrt.f32 %v2236_v4  ;;  %vm2245_vm0 = vmor %vm2243_vm15, %vm2244_vm14  ;;  %vm2253_vm2 = vweird.f32 %v2236_v4  ;;  %2910 = vmatpush.bf16.msrb.mxu1 %v3580_v42 }
 0x6f5   : > { %v2239_v56 = vmul.f32 %v3815_v44, %v2238_v6  ;;  %v3562_v6 = vld [vmem:[#allocation13 + $0x48] sm:$0xff] }
 0x6f7   : > { %v2240_v55 = vmul.f32 0.5, %v2239_v56  ;;  %2867 = vmatpush.bf16.msra.mxu2 %v3557_v60 }
 0x6f8   : > { %2911 = vmatpush.bf16.msrb.mxu1 %v3579_v25 }
 0x6f9   : > { %v2241_v62 = vsub.f32 1.5, %v2240_v55 }
 0x6fa   : > { %v3817_v32 = vpop.eup %3816 }
 0x6fb   : > { %v2242_v46 = vmul.f32 %v3815_v44, %v2241_v62  ;;  %v2248_v31 = vmul.f32 %v3817_v32, %v2236_v4  ;;  %vm2254_vm1 = vweird.f32 %v3817_v32  ;;  %2868 = vmatpush.bf16.msra.mxu2 %v3556_v9  ;;  %v3554_v4 = vld [vmem:[#allocation13 + $0x8] sm:$0xff] }
 0x6fc   : > { %vm2255_vm3 = vmor %vm2253_vm2, %vm2254_vm1  ;;  %2912 = vmatpush.bf16.msrb.mxu1 %v3578_v27 }
 0x6fd   : > { %v2249_v43 = vmul.f32 %v3817_v32, %v2248_v31  ;;  %v2246_v8 = vsel %vm2245_vm0, %v3815_v44, %v2242_v46 }
 0x6fe   : > { %v2257_v3 = vmul.f32 %v2246_v8, %v4974_v33  ;;  %v3576_v33 = vld [vmem:[#allocation13 + $0xb8] sm:$0xff] }
 0x6ff   : > { %v2250_v21 = vmul.f32 0.5, %v2249_v43  ;;  %2892 = vmatpush.bf16.msra.mxu0 %v3576_v33  ;;  %2869 = vmatpush.bf16.msra.mxu2 %v3555_v39 }
 0x700   : > { %v2262_v38 = vmul.f32 %v3773_v48, %v2257_v3  ;;  %2913 = vmatpush.bf16.msrb.mxu1 %v3577_v20 }
 0x701   : > { %v2251_v1 = vsub.f32 1.5, %v2250_v21  ;;  %v3553_v21 = vld [vmem:[#allocation13] sm:$0xff] }
 0x702   : > { %v2267_v12 = vadd.f32 %v3774_v28, %v2262_v38 }
 0x703   : > { %v2252_v13 = vmul.f32 %v3817_v32, %v2251_v1  ;;  %2893 = vmatpush.bf16.msra.mxu0 %v3575_v11  ;;  %2870 = vmatpush.bf16.msra.mxu2 %v3554_v4  ;;  %v3561_v1 = vld [vmem:[#allocation13 + $0x40] sm:$0xff] }
 0x705   : > { %v2256_v10 = vsel %vm2255_vm3, %v3817_v32, %v2252_v13 }
 0x706   : > { %v2258_v23 = vmul.f32 %v2256_v10, %v4980_v16  ;;  %v3568_v16 = vld [vmem:[#allocation13 + $0x78] sm:$0xff] }
 0x707   : > { %2878 = vmatpush.bf16.msrb.mxu3 %v3568_v16  ;;  %2894 = vmatpush.bf16.msra.mxu0 %v3574_v34 }
 0x708   : > { %v2263_v45 = vmul.f32 %v3773_v48, %v2258_v23  ;;  %2871 = vmatpush.bf16.msra.mxu2 %v3553_v21 }
 0x70a   : > { %v2268_v18 = vadd.f32 %v3774_v28, %v2263_v45 }
 0x70b   : > { %2879 = vmatpush.bf16.msrb.mxu3 %v3567_v17  ;;  %2895 = vmatpush.bf16.msra.mxu0 %v3573_v53 }
 0x70c   : > { %v2269_v63 = vpack.c.bf16 %v2268_v18, %v2267_v12 }
 0x70e   : > { %2480 = vmatmul.bf16.vlgmr.msrb.gmra.mxu2 %v2269_v63  ;;  %2494 = vmatmul.bf16.vlgmr.msra.gmra.mxu3 %v2269_v63 }
 0x70f   : > { %2508 = vmatmul.bf16.vlgmr.msrb.gmra.mxu0 %v2269_v63  ;;  %2522 = vmatmul.bf16.vlgmr.msra.gmra.mxu1 %v2269_v63 }
 0x710   : > { %2880 = vmatpush.bf16.msrb.mxu3 %v3566_v40  ;;  %2896 = vmatpush.bf16.msra.mxu0 %v3572_v59 }
 0x714   : > { %2881 = vmatpush.bf16.msrb.mxu3 %v3565_v36  ;;  %2897 = vmatpush.bf16.msra.mxu0 %v3571_v26 }
 0x718   : > { %2882 = vmatpush.bf16.msrb.mxu3 %v3564_v30  ;;  %2898 = vmatpush.bf16.msra.mxu0 %v3570_v47 }
 0x71c   : > { %2883 = vmatpush.bf16.msrb.mxu3 %v3563_v58  ;;  %2899 = vmatpush.bf16.msra.mxu0 %v3569_v19 }
 0x720   : > { %2884 = vmatpush.bf16.msrb.mxu3 %v3562_v6 }
 0x724   : > { %2885 = vmatpush.bf16.msrb.mxu3 %v3561_v1 }
 0x78c   : > { %v2509_v61 = vpop.f32.mrf.mxu0  ;;  %v2523_v15 = vpop.f32.mrf.mxu1 }
 0x78d   : > { %v4998_v0 = vadd.f32 %v2509_v61, %v2306_v37  ;;  %v5000_v57 = vadd.f32 %v2523_v15, %v2307_v35 }
 0x78f   : > { %v2538_v41 = vmul.f32 0.044715, %v4998_v0  ;;  %v2539_v44 = vmul.f32 0.044715, %v5000_v57  ;;  %v2530_v6 = vmul.f32 0.5, %v4998_v0 }
 0x791   : > { %v2546_v56 = vmul.f32 %v2538_v41, %v4998_v0  ;;  %v2547_v55 = vmul.f32 %v2539_v44, %v5000_v57  ;;  %v2481_v62 = vpop.f32.mrf.mxu2  ;;  %v2495_v32 = vpop.f32.mrf.mxu3 }
 0x792   : > { %v5008_v46 = vadd.f32 %v2481_v62, %v2304_v49  ;;  %v5010_v31 = vadd.f32 %v2495_v32, %v2305_v29  ;;  %v2531_v32 = vmul.f32 0.5, %v5000_v57 }
 0x793   : > { %v2554_v43 = vmul.f32 %v2546_v56, %v4998_v0  ;;  %v2555_v8 = vmul.f32 %v2547_v55, %v5000_v57 }
 0x794   : > { %v2536_v3 = vmul.f32 0.044715, %v5008_v46  ;;  %v2537_v48 = vmul.f32 0.044715, %v5010_v31  ;;  %v2511_v13 = vpop.f32.mrf.mxu0  ;;  %v2525_v10 = vpop.f32.mrf.mxu1 }
 0x795   : > { %v2562_v23 = vadd.f32 %v2554_v43, %v4998_v0  ;;  %v2512_v38 = vadd.f32 %v2511_v13, %v2306_v37  ;;  %v2526_v28 = vadd.f32 %v2525_v10, %v2307_v35  ;;  %v2563_v45 = vadd.f32 %v2555_v8, %v5000_v57 }
 0x796   : > { %v2544_v12 = vmul.f32 %v2536_v3, %v5008_v46  ;;  %v2545_v18 = vmul.f32 %v2537_v48, %v5010_v31 }
 0x797   : > { %v2542_v63 = vmul.f32 0.044715, %v2512_v38  ;;  %v2543_v11 = vmul.f32 0.044715, %v2526_v28  ;;  %v2570_v5 = vmul.f32 0.7978845, %v2562_v23 }
 0x798   : > { %v2552_v33 = vmul.f32 %v2544_v12, %v5008_v46  ;;  %v2553_v2 = vmul.f32 %v2545_v18, %v5010_v31  ;;  %v2571_v51 = vmul.f32 0.7978845, %v2563_v45  ;;  %v2534_v56 = vmul.f32 0.5, %v2512_v38 }
 0x799   : > { %v2550_v7 = vmul.f32 %v2542_v63, %v2512_v38  ;;  %v2483_v16 = vpop.f32.mrf.mxu2  ;;  %v2497_v34 = vpop.f32.mrf.mxu3  ;;  %v2551_v17 = vmul.f32 %v2543_v11, %v2526_v28  ;;  %3818 = vtanh.f32 %v2570_v5  ;;  %v2535_v43 = vmul.f32 0.5, %v2526_v28 }
 0x79a   : > { %v2560_v14 = vadd.f32 %v2552_v33, %v5008_v46  ;;  %v2484_v53 = vadd.f32 %v2483_v16, %v2304_v49  ;;  %v2561_v22 = vadd.f32 %v2553_v2, %v5010_v31  ;;  %v2498_v40 = vadd.f32 %v2497_v34, %v2305_v29 }
 0x79b   : > { %v2558_v52 = vmul.f32 %v2550_v7, %v2512_v38  ;;  %v2559_v42 = vmul.f32 %v2551_v17, %v2526_v28  ;;  %3820 = vtanh.f32 %v2571_v51  ;;  %v2528_v63 = vmul.f32 0.5, %v5008_v46  ;;  %v3775_v46 = vld [vmem:[%s5079_s11] ss:$0 sm:$0xff] }
 0x79c   : > { %v2568_v59 = vmul.f32 0.7978845, %v2560_v14  ;;  %v2540_v60 = vmul.f32 0.044715, %v2484_v53  ;;  %v2541_v26 = vmul.f32 0.044715, %v2498_v40 }
 0x79d   : > { %v2566_v36 = vadd.f32 %v2558_v52, %v2512_v38  ;;  %v2567_v24 = vadd.f32 %v2559_v42, %v2526_v28  ;;  %v2569_v9 = vmul.f32 0.7978845, %v2561_v22  ;;  %v2532_v0 = vmul.f32 0.5, %v2484_v53 }
 0x79e   : > { %v2548_v25 = vmul.f32 %v2540_v60, %v2484_v53  ;;  %v2549_v37 = vmul.f32 %v2541_v26, %v2498_v40  ;;  %3822 = vtanh.f32 %v2568_v59  ;;  %v2529_v33 = vmul.f32 0.5, %v5010_v31 }
 0x79f   : > { %v2574_v30 = vmul.f32 0.7978845, %v2566_v36  ;;  %v2575_v35 = vmul.f32 0.7978845, %v2567_v24  ;;  %v3819_v58 = vpop.eup %3818  ;;  %v2533_v57 = vmul.f32 0.5, %v2498_v40 }
 0x7a0   : > { %v2556_v47 = vmul.f32 %v2548_v25, %v2484_v53  ;;  %v2557_v27 = vmul.f32 %v2549_v37, %v2498_v40  ;;  %v2586_v29 = vadd.f32 1.0, %v3819_v58 }
 0x7a1   : > { %3824 = vtanh.f32 %v2574_v30  ;;  %v3821_v15 = vpop.eup %3820 }
 0x7a2   : > { %v2564_v39 = vadd.f32 %v2556_v47, %v2484_v53  ;;  %3826 = vtanh.f32 %v2575_v35  ;;  %v2565_v61 = vadd.f32 %v2557_v27, %v2498_v40  ;;  %v2587_v44 = vadd.f32 1.0, %v3821_v15 }
 0x7a3   : > { %3828 = vtanh.f32 %v2569_v9  ;;  %v2594_v21 = vmul.f32 %v2586_v29, %v2530_v6 }
 0x7a4   : > { %v2572_v19 = vmul.f32 0.7978845, %v2564_v39  ;;  %v2573_v20 = vmul.f32 0.7978845, %v2565_v61  ;;  %v3823_v49 = vpop.eup %3822  ;;  %v2595_v3 = vmul.f32 %v2587_v44, %v2531_v32 }
 0x7a5   : > { %v2584_v13 = vadd.f32 1.0, %v3823_v49 }
 0x7a6   : > { %3830 = vtanh.f32 %v2572_v19 }
 0x7a7   : > { %v3825_v41 = vpop.eup %3824  ;;  %3832 = vtanh.f32 %v2573_v20  ;;  %v2592_v2 = vmul.f32 %v2584_v13, %v2528_v63 }
 0x7a8   : > { %v3827_v4 = vpop.eup %3826  ;;  %v2590_v55 = vadd.f32 1.0, %v3825_v41 }
 0x7a9   : > { %v3829_v62 = vpop.eup %3828  ;;  %v2591_v8 = vadd.f32 1.0, %v3827_v4 }
 0x7aa   : > { %v2598_v1 = vmul.f32 %v2590_v55, %v2534_v56  ;;  %v2585_v45 = vadd.f32 1.0, %v3829_v62 }
 0x7ab   : > { %v2599_v48 = vmul.f32 %v2591_v8, %v2535_v43 }
 0x7ac   : > { %v3831_v10 = vpop.eup %3830  ;;  %v2602_v23 = vpack.c.bf16 %v2598_v1, %v2594_v21  ;;  %v2593_v5 = vmul.f32 %v2585_v45, %v2529_v33 }
 0x7ad   : > { %v3833_v12 = vpop.eup %3832  ;;  %v2603_v18 = vpack.c.bf16 %v2599_v48, %v2595_v3  ;;  %v2588_v38 = vadd.f32 1.0, %v3831_v10 }
 0x7ae   : > { %2900 = vmatmul.bf16.vlgmr.msra.gmra.mxu0 %v2602_v23  ;;  %v2589_v28 = vadd.f32 1.0, %v3833_v12 }
 0x7af   : > { %2914 = vmatmul.bf16.vlgmr.msrb.gmra.mxu1 %v2603_v18  ;;  %v2596_v11 = vmul.f32 %v2588_v38, %v2532_v0 }
 0x7b0   : > { %v2597_v7 = vmul.f32 %v2589_v28, %v2533_v57 }
 0x7b1   : > { %v2600_v16 = vpack.c.bf16 %v2596_v11, %v2592_v2 }
 0x7b2   : > { %v2601_v34 = vpack.c.bf16 %v2597_v7, %v2593_v5 }
 0x7b3   : > { %2872 = vmatmul.bf16.vlgmr.msra.gmra.mxu2 %v2600_v16 }
 0x7b4   : > { %2886 = vmatmul.bf16.vlgmr.msrb.gmra.mxu3 %v2601_v34 }
 0x82b   : > { %v2901_v17 = vpop.f32.mrf.mxu0 }
 0x82c   : > { %v2915_v22 = vpop.f32.mrf.mxu1 }
 0x833   : > { %v2903_v24 = vpop.f32.mrf.mxu0 }
 0x834   : > { %v2917_v9 = vpop.f32.mrf.mxu1 }
 0x836   : > { %v2873_v51 = vpop.f32.mrf.mxu2 }
 0x837   : > { %v2874_v14 = vadd.f32 %v3775_v46, %v2873_v51  ;;  %v2887_v31 = vpop.f32.mrf.mxu3 }
 0x839   : > { %v2888_v53 = vadd.f32 %v2887_v31, %v2874_v14 }
 0x83b   : > { %v2902_v52 = vadd.f32 %v2901_v17, %v2888_v53 }
 0x83d   : > { %v2916_v40 = vadd.f32 %v2915_v22, %v2902_v52 }
 0x83e   : > { %v2875_v59 = vpop.f32.mrf.mxu2 }
 0x83f   : > { %v2920_v42 = vadd.f32 %v2916_v40, %v4965_v50  ;;  %v2876_v60 = vadd.f32 %v3775_v46, %v2875_v59  ;;  %v2889_v36 = vpop.f32.mrf.mxu3 }
 0x841   : > { %2922 = vst [vmem:[%s528_s3] sm:$0xff] %v2920_v42  ;;  %v2890_v26 = vadd.f32 %v2889_v36, %v2876_v60 }
 0x843   : > { %v2904_v25 = vadd.f32 %v2903_v24, %v2890_v26 }
 0x845   : > { %v2918_v30 = vadd.f32 %v2917_v9, %v2904_v25 }
 0x847   : > { %v2921_v50 = vadd.f32 %v2918_v30, %v4969_v54 }
 0x849   : > { %2923 = vst [vmem:[%s528_s3 + $0x8] sm:$0xff] %v2921_v50 }
 0x84a   : > { %4073 = shalt.err (!%p4070_p9)
}
 0x84b   : > { %s4147_s15 = smov 128   ;;  %s4148_s14 = smov 8  }
 0x84c   : > { %3612 = dma.vmem_to_hbm [thread:$0]  (%p4317_p5), %s2938_s26, 256, %s2940_s13, %s2925_s28, %s4147_s15, %s4147_s15, %s4148_s14  }
 0x84d PF: > { %s2954_s3 = sand.u32 1, %s4112_s21   ;;  %p5103_p10 = scmp.ge.s32.totalorder %s4124_s24, 2 }
 0x84e   : > { %s2955_s7 = scalar_lea.sflag [#allocation4], %s2954_s3 }
 0x84f   : > { %p3638_p13 = pnand %p5103_p10, %p4321_p6 }
 0x851   : > { %p3639_p11 = pneg %p3638_p13 }
 0x853   : > { %4107 = dma.done.wait (%p3639_p11), %s2955_s7, 256  }
 0x854   : > { %4109 = vsyncadd (%p3639_p11), %s2955_s7, 4294967040  ;;  %p28_p0 = scmp.ge.s32.totalorder %s4291_s30, 4   ;;  %s5104_s21 = smov %s4116_s22 }
 0x855   : > { %s5105_s22 = smov %s4120_s23  ;;  %s5106_s23 = smov %s4302_s18 }
 0x856   : > { %s5107_s24 = smov %s4291_s30  ;;  %30 = sbr.rel (!%p28_p0) target bundleno = 16 (0x10), region = 137 }
 0x85b   :  { %2961 = vsyncpa [#allocation3], 1 }
 0x85c   :  { %2963 = vsyncpa [#allocation3 + $0x1], 1 }
 0x85d   :  { %2964 = vsyncpa [#allocation6], 1 }
 0x85e   :  { %2965 = vsyncpa [#allocation9], 1 }
 0x85f   :  { %2966 = vsyncpa [#allocation12], 1 }
 0x860   :  { %2967 = vsyncpa [#allocation4], 1 }
 0x861   :  { %2969 = vsyncpa [#allocation4 + $0x1], 1 }

</bundles_post_ra>
